<compile_context>
chip_gen: v7x
topology: tpu7x:2x2x1
jax: 0.10.0
libtpu: 0.0.40
codegen_flags: <defaults>
</compile_context>

<pallas_src>
import functools

import jax
import jax.numpy as jnp
from jax import lax
from jax.experimental import pallas as pl
from jax.experimental.pallas import tpu as pltpu


VMEM_SPEC = pl.BlockSpec(memory_space=pltpu.MemorySpace.VMEM)

N_CLASSES = 8
IN_FEATURES = 6


# ----------------------------------------------------------------------------
# Fused kernel: LSTM (unrolled) -> fused flatten+Linear1 -> BN -> Linear2 -> BN
#               -> Linear3 -> BN -> Softmax
#   x:      (B, T*6)       batch-major input, time flattened into lanes
#   w_in:   (T*6+1, T*4H)  rows[0:T*6]=block_diag(W_ih^T x T), row[T*6]=bias tiled T times
#   whh:    (H, 4H)        = W_hh^T   (PyTorch gate order: i, f, g, o)
#   st:     (2B, H)        rows[0:B]=h0, rows[B:2B]=c0
#   hw:     (T*H+2C, C)    rows[0:T*H]=W1^T, next C rows=W2^T, next C rows=W3^T (lane-padded to C)
#   hv:     (9, C)         rows: b1,g1,be1,b2,g2,be2,b3,g3,be3 (last three lane-padded to C)
#   out:    (B, 8)         class probabilities
# ----------------------------------------------------------------------------
def fused_har_kernel(x_ref, w_in_ref, whh_ref, st_ref, hw_ref, hv_ref, out_ref,
                     *, T, H):
    B = x_ref.shape[0]
    F = IN_FEATURES
    G = 4 * H
    C = hw_ref.shape[1]
    n_cls = out_ref.shape[1]
    eps = 1e-5

    # ---- LSTM input projections for ALL steps in one aligned MXU pass -------
    gx_all = jnp.dot(x_ref[...], w_in_ref[0:T * F, :],
                     preferred_element_type=jnp.float32)
    gx_all = gx_all + w_in_ref[T * F:T * F + 1, :]          # (B, T*4H)

    whh_t = whh_ref[...]                                     # (H, 4H)
    h = st_ref[0:B, :]                                       # (B, H)
    c = st_ref[B:2 * B, :]                                   # (B, H)

    # flat @ W1 == sum_t h_t @ W1[t*H:(t+1)*H]  (fused head layer-1 accumulator)
    acc1 = jnp.zeros((B, C), jnp.float32)

    for t in range(T):            # static unroll: T is a compile-time constant
        gates = gx_all[:, t * G:(t + 1) * G] + jnp.dot(
            h, whh_t, preferred_element_type=jnp.float32)
        sg = jax.nn.sigmoid(gates)       # one full-width EUP pass (i, f, _, o)
        tg = jnp.tanh(gates)             # one full-width EUP pass (_, _, g, _)
        i_g = sg[:, 0 * H:1 * H]
        f_g = sg[:, 1 * H:2 * H]
        g_g = tg[:, 2 * H:3 * H]
        o_g = sg[:, 3 * H:4 * H]
        c = f_g * c + i_g * g_g
        h = o_g * jnp.tanh(c)
        # head layer-1 contribution: off the serial recurrence chain
        acc1 = acc1 + jnp.dot(h, hw_ref[t * H:(t + 1) * H, :],
                              preferred_element_type=jnp.float32)

    # ---- head: (Linear -> BN) x3 -> Softmax ----------------------------------
    def batchnorm(a, gamma, beta):
        mu = jnp.mean(a, axis=0, keepdims=True)
        var = jnp.mean((a - mu) ** 2, axis=0, keepdims=True)   # biased (train mode)
        return gamma * (a - mu) * lax.rsqrt(var + eps) + beta

    o1 = T * H
    o2 = o1 + C
    o3 = o2 + C

    a = batchnorm(acc1 + hv_ref[0:1, :], hv_ref[1:2, :], hv_ref[2:3, :])
    a = jnp.dot(a, hw_ref[o1:o2, :], preferred_element_type=jnp.float32) + hv_ref[3:4, :]
    a = batchnorm(a, hv_ref[4:5, :], hv_ref[5:6, :])
    a = jnp.dot(a, hw_ref[o2:o3, :], preferred_element_type=jnp.float32) + hv_ref[6:7, :]
    a = batchnorm(a, hv_ref[7:8, :], hv_ref[8:9, :])

    # Softmax over dim=1; padded lanes of the third linear never feed these lanes.
    logits = a[:, 0:n_cls]
    m = jnp.max(logits, axis=1, keepdims=True)
    e = jnp.exp(logits - m)
    out_ref[...] = e / jnp.sum(e, axis=1, keepdims=True)


# ----------------------------------------------------------------------------
# One-time parameter packing (outside the per-call hot path): fewer, larger,
# aligned VMEM operands.
# ----------------------------------------------------------------------------
def pack_params(params, window):
    T = window
    F = IN_FEATURES
    H = params["whh_t"].shape[0]
    G = 4 * H
    C = params["w1_t"].shape[1]

    # block-diagonal W_ih^T so one matmul computes every step's input projection
    w_blk = jnp.zeros((T * F, T * G), jnp.float32)
    for t in range(T):
        w_blk = w_blk.at[t * F:(t + 1) * F, t * G:(t + 1) * G].set(params["wih_t"])
    b_tiled = jnp.tile(params["b_lstm"], (1, T))
    w_in = jnp.concatenate([w_blk, b_tiled], axis=0)               # (T*F+1, T*4H)

    state0 = jnp.concatenate([params["h0"], params["c0"]], axis=0)  # (2B, H)

    w3pad = jnp.zeros((C, C), jnp.float32).at[:, :N_CLASSES].set(params["w3_t"])
    head_w = jnp.concatenate([params["w1_t"], params["w2_t"], w3pad], axis=0)

    def pad_row(v):
        return jnp.zeros((1, C), jnp.float32).at[:, :v.shape[1]].set(v)

    head_v = jnp.concatenate(
        [params["b1"], params["g1"], params["be1"],
         params["b2"], params["g2"], params["be2"],
         pad_row(params["b3"]), pad_row(params["g3"]), pad_row(params["be3"])],
        axis=0)                                                     # (9, C)

    return {"w_in": w_in, "whh_t": params["whh_t"], "state0": state0,
            "head_w": head_w, "head_v": head_v}


# ----------------------------------------------------------------------------
# Wrapper: one fused pallas_call, no grid (everything is trivially VMEM-resident).
# NOTE(v7x): to engage the second TensorCore, batch N independent windows and add
# a leading "parallel" grid axis; a single (B=8, T=8) instance is too small to shard.
# ----------------------------------------------------------------------------
def model_har_forward(x, packed):
    """x: (B, window, 6)  ->  (B, 8) class probabilities."""
    B, T, F = x.shape
    H = packed["whh_t"].shape[0]
    x2 = x.reshape(B, T * F)   # contiguous reshape: free (no transpose, no copy)

    return pl.pallas_call(
        functools.partial(fused_har_kernel, T=T, H=H),
        out_shape=jax.ShapeDtypeStruct((B, N_CLASSES), jnp.float32),
        in_specs=[VMEM_SPEC] * 6,
        out_specs=VMEM_SPEC,
    )(x2, packed["w_in"], packed["whh_t"], packed["state0"],
      packed["head_w"], packed["head_v"])


# ----------------------------------------------------------------------------
# Pure-JAX reference (same math, no Pallas) for a correctness check.
# ----------------------------------------------------------------------------
def model_har_reference(x, params):
    B, T, _ = x.shape
    H = params["h0"].shape[-1]
    x_tm = jnp.transpose(x, (1, 0, 2))

    def step(carry, x_t):
        h, c = carry
        gates = x_t @ params["wih_t"] + h @ params["whh_t"] + params["b_lstm"]
        i_g = jax.nn.sigmoid(gates[:, 0 * H:1 * H])
        f_g = jax.nn.sigmoid(gates[:, 1 * H:2 * H])
        g_g = jnp.tanh(gates[:, 2 * H:3 * H])
        o_g = jax.nn.sigmoid(gates[:, 3 * H:4 * H])
        c = f_g * c + i_g * g_g
        h = o_g * jnp.tanh(c)
        return (h, c), h

    (_, _), hs = lax.scan(step, (params["h0"], params["c0"]), x_tm)
    flat = jnp.transpose(hs, (1, 0, 2)).reshape(B, T * H)

    def bn(h, g, b):
        mu = jnp.mean(h, axis=0, keepdims=True)
        var = jnp.mean((h - mu) ** 2, axis=0, keepdims=True)
        return g * (h - mu) / jnp.sqrt(var + 1e-5) + b

    h = bn(flat @ params["w1_t"] + params["b1"], params["g1"], params["be1"])
    h = bn(h @ params["w2_t"] + params["b2"], params["g2"], params["be2"])
    h = bn(h @ params["w3_t"] + params["b3"], params["g3"], params["be3"])
    return jax.nn.softmax(h, axis=1)


def init_params(key, batch, hidden, window):
    C = hidden  # coefficient * hidden_size, coefficient = 1 (unidirectional)
    ks = jax.random.split(key, 16)
    s = 0.1
    return {
        # LSTM: W_ih (4H, 6), W_hh (4H, H), b_ih + b_hh (4H,) -- stored transposed.
        "wih_t": s * jax.random.normal(ks[0], (IN_FEATURES, 4 * hidden), jnp.float32),
        "whh_t": s * jax.random.normal(ks[1], (hidden, 4 * hidden), jnp.float32),
        "b_lstm": s * jax.random.normal(ks[2], (1, 4 * hidden), jnp.float32),
        "h0": jax.random.normal(ks[3], (batch, hidden), jnp.float32),
        "c0": jax.random.normal(ks[4], (batch, hidden), jnp.float32),
        # Linear(window*hidden -> C)
        "w1_t": s * jax.random.normal(ks[5], (window * hidden, C), jnp.float32),
        "b1": s * jax.random.normal(ks[6], (1, C), jnp.float32),
        "g1": 1.0 + 0.1 * jax.random.normal(ks[7], (1, C), jnp.float32),
        "be1": 0.1 * jax.random.normal(ks[8], (1, C), jnp.float32),
        # Linear(C -> C)
        "w2_t": s * jax.random.normal(ks[9], (C, C), jnp.float32),
        "b2": s * jax.random.normal(ks[10], (1, C), jnp.float32),
        "g2": 1.0 + 0.1 * jax.random.normal(ks[11], (1, C), jnp.float32),
        "be2": 0.1 * jax.random.normal(ks[12], (1, C), jnp.float32),
        # Linear(C -> 8)
        "w3_t": s * jax.random.normal(ks[13], (C, N_CLASSES), jnp.float32),
        "b3": s * jax.random.normal(ks[14], (1, N_CLASSES), jnp.float32),
        "g3": jnp.ones((1, N_CLASSES), jnp.float32),
        "be3": jnp.zeros((1, N_CLASSES), jnp.float32),
    }


if __name__ == "__main__":
    BATCH, HIDDEN, WINDOW = 8, 32, 8

    key = jax.random.PRNGKey(0)
    k_x, k_p = jax.random.split(key)
    x = jax.random.normal(k_x, (BATCH, WINDOW, IN_FEATURES), jnp.float32)
    params = init_params(k_p, BATCH, HIDDEN, WINDOW)
    packed = pack_params(params, WINDOW)      # once, off the per-call hot path

    fwd = jax.jit(model_har_forward)
    out = jax.block_until_ready(fwd(x, packed))

    ref = model_har_reference(x, params)
    assert out.shape == (BATCH, N_CLASSES)
    assert bool(jnp.allclose(jnp.sum(out, axis=1), 1.0, atol=1e-4))
    assert bool(jnp.allclose(out, ref, rtol=2e-4, atol=2e-4)), "mismatch vs JAX reference"

    print("KERNEL_OK")
</pallas_src>

<mosaic_0001>
module attributes {stable_mosaic.version = 11 : i64} {
  func.func @fused_har_kernel(%arg0: memref<8x48xf32, #tpu.memory_space<vmem>>, %arg1: memref<49x1024xf32, #tpu.memory_space<vmem>>, %arg2: memref<32x128xf32, #tpu.memory_space<vmem>>, %arg3: memref<16x32xf32, #tpu.memory_space<vmem>>, %arg4: memref<320x32xf32, #tpu.memory_space<vmem>>, %arg5: memref<9x32xf32, #tpu.memory_space<vmem>>, %arg6: memref<8x8xf32, #tpu.memory_space<vmem>>) attributes {dimension_semantics = [], scalar_prefetch = 0 : i64, scratch_operands = 0 : i64, tpu.core_type = #tpu.core_type<tc>} {
    %c0 = arith.constant 0 : index
    %c0_0 = arith.constant 0 : index
    %0 = vector.load %arg0[%c0, %c0_0] : memref<8x48xf32, #tpu.memory_space<vmem>>, vector<8x48xf32>
    %c0_1 = arith.constant 0 : index
    %c0_2 = arith.constant 0 : index
    %1 = vector.load %arg1[%c0_1, %c0_2] : memref<49x1024xf32, #tpu.memory_space<vmem>>, vector<48x1024xf32>
    %cst = arith.constant dense<0.000000e+00> : vector<8x1024xf32>
    %2 = tpu.matmul %0, %1, %cst {dimension_numbers = #tpu.dot_dimension_numbers<[1], [0], [0], [1], [0, 0, 1, 1], [], []>} : vector<8x48xf32>, vector<48x1024xf32>, vector<8x1024xf32> -> vector<8x1024xf32>
    %c48 = arith.constant 48 : index
    %c0_3 = arith.constant 0 : index
    %3 = vector.load %arg1[%c48, %c0_3] : memref<49x1024xf32, #tpu.memory_space<vmem>>, vector<1x1024xf32>
    %4 = vector.broadcast %3 : vector<1x1024xf32> to vector<8x1024xf32>
    %5 = arith.addf %2, %4 : vector<8x1024xf32>
    %c0_4 = arith.constant 0 : index
    %c0_5 = arith.constant 0 : index
    %6 = vector.load %arg2[%c0_4, %c0_5] : memref<32x128xf32, #tpu.memory_space<vmem>>, vector<32x128xf32>
    %c0_6 = arith.constant 0 : index
    %c0_7 = arith.constant 0 : index
    %7 = vector.load %arg3[%c0_6, %c0_7] : memref<16x32xf32, #tpu.memory_space<vmem>>, vector<8x32xf32>
    %c8 = arith.constant 8 : index
    %c0_8 = arith.constant 0 : index
    %8 = vector.load %arg3[%c8, %c0_8] : memref<16x32xf32, #tpu.memory_space<vmem>>, vector<8x32xf32>
    %cst_9 = arith.constant 0.000000e+00 : f32
    %9 = vector.broadcast %cst_9 : f32 to vector<8x32xf32>
    %10 = vector.extract_strided_slice %5 {offsets = [0, 0], sizes = [8, 128], strides = [1, 1]} : vector<8x1024xf32> to vector<8x128xf32>
    %cst_10 = arith.constant dense<0.000000e+00> : vector<8x128xf32>
    %11 = tpu.matmul %7, %6, %cst_10 {dimension_numbers = #tpu.dot_dimension_numbers<[1], [0], [0], [1], [0, 0, 1, 1], [], []>} : vector<8x32xf32>, vector<32x128xf32>, vector<8x128xf32> -> vector<8x128xf32>
    %12 = arith.addf %10, %11 : vector<8x128xf32>
    %13 = arith.negf %12 : vector<8x128xf32>
    %14 = math.exp %13 : vector<8x128xf32>
    %cst_11 = arith.constant 1.000000e+00 : f32
    %15 = vector.broadcast %cst_11 : f32 to vector<8x128xf32>
    %16 = arith.addf %15, %14 : vector<8x128xf32>
    %17 = arith.divf %15, %16 : vector<8x128xf32>
    %18 = math.tanh %12 : vector<8x128xf32>
    %19 = vector.extract_strided_slice %17 {offsets = [0, 0], sizes = [8, 32], strides = [1, 1]} : vector<8x128xf32> to vector<8x32xf32>
    %20 = vector.extract_strided_slice %17 {offsets = [0, 32], sizes = [8, 32], strides = [1, 1]} : vector<8x128xf32> to vector<8x32xf32>
    %21 = vector.extract_strided_slice %18 {offsets = [0, 64], sizes = [8, 32], strides = [1, 1]} : vector<8x128xf32> to vector<8x32xf32>
    %22 = vector.extract_strided_slice %17 {offsets = [0, 96], sizes = [8, 32], strides = [1, 1]} : vector<8x128xf32> to vector<8x32xf32>
    %23 = arith.mulf %20, %8 : vector<8x32xf32>
    %24 = arith.mulf %19, %21 : vector<8x32xf32>
    %25 = arith.addf %23, %24 : vector<8x32xf32>
    %26 = math.tanh %25 : vector<8x32xf32>
    %27 = arith.mulf %22, %26 : vector<8x32xf32>
    %c0_12 = arith.constant 0 : index
    %c0_13 = arith.constant 0 : index
    %28 = vector.load %arg4[%c0_12, %c0_13] : memref<320x32xf32, #tpu.memory_space<vmem>>, vector<32x32xf32>
    %cst_14 = arith.constant dense<0.000000e+00> : vector<8x32xf32>
    %29 = tpu.matmul %27, %28, %cst_14 {dimension_numbers = #tpu.dot_dimension_numbers<[1], [0], [0], [1], [0, 0, 1, 1], [], []>} : vector<8x32xf32>, vector<32x32xf32>, vector<8x32xf32> -> vector<8x32xf32>
    %30 = arith.addf %9, %29 : vector<8x32xf32>
    %31 = vector.extract_strided_slice %5 {offsets = [0, 128], sizes = [8, 128], strides = [1, 1]} : vector<8x1024xf32> to vector<8x128xf32>
    %cst_15 = arith.constant dense<0.000000e+00> : vector<8x128xf32>
    %32 = tpu.matmul %27, %6, %cst_15 {dimension_numbers = #tpu.dot_dimension_numbers<[1], [0], [0], [1], [0, 0, 1, 1], [], []>} : vector<8x32xf32>, vector<32x128xf32>, vector<8x128xf32> -> vector<8x128xf32>
    %33 = arith.addf %31, %32 : vector<8x128xf32>
    %34 = arith.negf %33 : vector<8x128xf32>
    %35 = math.exp %34 : vector<8x128xf32>
    %cst_16 = arith.constant 1.000000e+00 : f32
    %36 = vector.broadcast %cst_16 : f32 to vector<8x128xf32>
    %37 = arith.addf %36, %35 : vector<8x128xf32>
    %38 = arith.divf %36, %37 : vector<8x128xf32>
    %39 = math.tanh %33 : vector<8x128xf32>
    %40 = vector.extract_strided_slice %38 {offsets = [0, 0], sizes = [8, 32], strides = [1, 1]} : vector<8x128xf32> to vector<8x32xf32>
    %41 = vector.extract_strided_slice %38 {offsets = [0, 32], sizes = [8, 32], strides = [1, 1]} : vector<8x128xf32> to vector<8x32xf32>
    %42 = vector.extract_strided_slice %39 {offsets = [0, 64], sizes = [8, 32], strides = [1, 1]} : vector<8x128xf32> to vector<8x32xf32>
    %43 = vector.extract_strided_slice %38 {offsets = [0, 96], sizes = [8, 32], strides = [1, 1]} : vector<8x128xf32> to vector<8x32xf32>
    %44 = arith.mulf %41, %25 : vector<8x32xf32>
    %45 = arith.mulf %40, %42 : vector<8x32xf32>
    %46 = arith.addf %44, %45 : vector<8x32xf32>
    %47 = math.tanh %46 : vector<8x32xf32>
    %48 = arith.mulf %43, %47 : vector<8x32xf32>
    %c32 = arith.constant 32 : index
    %c0_17 = arith.constant 0 : index
    %49 = vector.load %arg4[%c32, %c0_17] : memref<320x32xf32, #tpu.memory_space<vmem>>, vector<32x32xf32>
    %cst_18 = arith.constant dense<0.000000e+00> : vector<8x32xf32>
    %50 = tpu.matmul %48, %49, %cst_18 {dimension_numbers = #tpu.dot_dimension_numbers<[1], [0], [0], [1], [0, 0, 1, 1], [], []>} : vector<8x32xf32>, vector<32x32xf32>, vector<8x32xf32> -> vector<8x32xf32>
    %51 = arith.addf %30, %50 : vector<8x32xf32>
    %52 = vector.extract_strided_slice %5 {offsets = [0, 256], sizes = [8, 128], strides = [1, 1]} : vector<8x1024xf32> to vector<8x128xf32>
    %cst_19 = arith.constant dense<0.000000e+00> : vector<8x128xf32>
    %53 = tpu.matmul %48, %6, %cst_19 {dimension_numbers = #tpu.dot_dimension_numbers<[1], [0], [0], [1], [0, 0, 1, 1], [], []>} : vector<8x32xf32>, vector<32x128xf32>, vector<8x128xf32> -> vector<8x128xf32>
    %54 = arith.addf %52, %53 : vector<8x128xf32>
    %55 = arith.negf %54 : vector<8x128xf32>
    %56 = math.exp %55 : vector<8x128xf32>
    %cst_20 = arith.constant 1.000000e+00 : f32
    %57 = vector.broadcast %cst_20 : f32 to vector<8x128xf32>
    %58 = arith.addf %57, %56 : vector<8x128xf32>
    %59 = arith.divf %57, %58 : vector<8x128xf32>
    %60 = math.tanh %54 : vector<8x128xf32>
    %61 = vector.extract_strided_slice %59 {offsets = [0, 0], sizes = [8, 32], strides = [1, 1]} : vector<8x128xf32> to vector<8x32xf32>
    %62 = vector.extract_strided_slice %59 {offsets = [0, 32], sizes = [8, 32], strides = [1, 1]} : vector<8x128xf32> to vector<8x32xf32>
    %63 = vector.extract_strided_slice %60 {offsets = [0, 64], sizes = [8, 32], strides = [1, 1]} : vector<8x128xf32> to vector<8x32xf32>
    %64 = vector.extract_strided_slice %59 {offsets = [0, 96], sizes = [8, 32], strides = [1, 1]} : vector<8x128xf32> to vector<8x32xf32>
    %65 = arith.mulf %62, %46 : vector<8x32xf32>
    %66 = arith.mulf %61, %63 : vector<8x32xf32>
    %67 = arith.addf %65, %66 : vector<8x32xf32>
    %68 = math.tanh %67 : vector<8x32xf32>
    %69 = arith.mulf %64, %68 : vector<8x32xf32>
    %c64 = arith.constant 64 : index
    %c0_21 = arith.constant 0 : index
    %70 = vector.load %arg4[%c64, %c0_21] : memref<320x32xf32, #tpu.memory_space<vmem>>, vector<32x32xf32>
    %cst_22 = arith.constant dense<0.000000e+00> : vector<8x32xf32>
    %71 = tpu.matmul %69, %70, %cst_22 {dimension_numbers = #tpu.dot_dimension_numbers<[1], [0], [0], [1], [0, 0, 1, 1], [], []>} : vector<8x32xf32>, vector<32x32xf32>, vector<8x32xf32> -> vector<8x32xf32>
    %72 = arith.addf %51, %71 : vector<8x32xf32>
    %73 = vector.extract_strided_slice %5 {offsets = [0, 384], sizes = [8, 128], strides = [1, 1]} : vector<8x1024xf32> to vector<8x128xf32>
    %cst_23 = arith.constant dense<0.000000e+00> : vector<8x128xf32>
    %74 = tpu.matmul %69, %6, %cst_23 {dimension_numbers = #tpu.dot_dimension_numbers<[1], [0], [0], [1], [0, 0, 1, 1], [], []>} : vector<8x32xf32>, vector<32x128xf32>, vector<8x128xf32> -> vector<8x128xf32>
    %75 = arith.addf %73, %74 : vector<8x128xf32>
    %76 = arith.negf %75 : vector<8x128xf32>
    %77 = math.exp %76 : vector<8x128xf32>
    %cst_24 = arith.constant 1.000000e+00 : f32
    %78 = vector.broadcast %cst_24 : f32 to vector<8x128xf32>
    %79 = arith.addf %78, %77 : vector<8x128xf32>
    %80 = arith.divf %78, %79 : vector<8x128xf32>
    %81 = math.tanh %75 : vector<8x128xf32>
    %82 = vector.extract_strided_slice %80 {offsets = [0, 0], sizes = [8, 32], strides = [1, 1]} : vector<8x128xf32> to vector<8x32xf32>
    %83 = vector.extract_strided_slice %80 {offsets = [0, 32], sizes = [8, 32], strides = [1, 1]} : vector<8x128xf32> to vector<8x32xf32>
    %84 = vector.extract_strided_slice %81 {offsets = [0, 64], sizes = [8, 32], strides = [1, 1]} : vector<8x128xf32> to vector<8x32xf32>
    %85 = vector.extract_strided_slice %80 {offsets = [0, 96], sizes = [8, 32], strides = [1, 1]} : vector<8x128xf32> to vector<8x32xf32>
    %86 = arith.mulf %83, %67 : vector<8x32xf32>
    %87 = arith.mulf %82, %84 : vector<8x32xf32>
    %88 = arith.addf %86, %87 : vector<8x32xf32>
    %89 = math.tanh %88 : vector<8x32xf32>
    %90 = arith.mulf %85, %89 : vector<8x32xf32>
    %c96 = arith.constant 96 : index
    %c0_25 = arith.constant 0 : index
    %91 = vector.load %arg4[%c96, %c0_25] : memref<320x32xf32, #tpu.memory_space<vmem>>, vector<32x32xf32>
    %cst_26 = arith.constant dense<0.000000e+00> : vector<8x32xf32>
    %92 = tpu.matmul %90, %91, %cst_26 {dimension_numbers = #tpu.dot_dimension_numbers<[1], [0], [0], [1], [0, 0, 1, 1], [], []>} : vector<8x32xf32>, vector<32x32xf32>, vector<8x32xf32> -> vector<8x32xf32>
    %93 = arith.addf %72, %92 : vector<8x32xf32>
    %94 = vector.extract_strided_slice %5 {offsets = [0, 512], sizes = [8, 128], strides = [1, 1]} : vector<8x1024xf32> to vector<8x128xf32>
    %cst_27 = arith.constant dense<0.000000e+00> : vector<8x128xf32>
    %95 = tpu.matmul %90, %6, %cst_27 {dimension_numbers = #tpu.dot_dimension_numbers<[1], [0], [0], [1], [0, 0, 1, 1], [], []>} : vector<8x32xf32>, vector<32x128xf32>, vector<8x128xf32> -> vector<8x128xf32>
    %96 = arith.addf %94, %95 : vector<8x128xf32>
    %97 = arith.negf %96 : vector<8x128xf32>
    %98 = math.exp %97 : vector<8x128xf32>
    %cst_28 = arith.constant 1.000000e+00 : f32
    %99 = vector.broadcast %cst_28 : f32 to vector<8x128xf32>
    %100 = arith.addf %99, %98 : vector<8x128xf32>
    %101 = arith.divf %99, %100 : vector<8x128xf32>
    %102 = math.tanh %96 : vector<8x128xf32>
    %103 = vector.extract_strided_slice %101 {offsets = [0, 0], sizes = [8, 32], strides = [1, 1]} : vector<8x128xf32> to vector<8x32xf32>
    %104 = vector.extract_strided_slice %101 {offsets = [0, 32], sizes = [8, 32], strides = [1, 1]} : vector<8x128xf32> to vector<8x32xf32>
    %105 = vector.extract_strided_slice %102 {offsets = [0, 64], sizes = [8, 32], strides = [1, 1]} : vector<8x128xf32> to vector<8x32xf32>
    %106 = vector.extract_strided_slice %101 {offsets = [0, 96], sizes = [8, 32], strides = [1, 1]} : vector<8x128xf32> to vector<8x32xf32>
    %107 = arith.mulf %104, %88 : vector<8x32xf32>
    %108 = arith.mulf %103, %105 : vector<8x32xf32>
    %109 = arith.addf %107, %108 : vector<8x32xf32>
    %110 = math.tanh %109 : vector<8x32xf32>
    %111 = arith.mulf %106, %110 : vector<8x32xf32>
    %c128 = arith.constant 128 : index
    %c0_29 = arith.constant 0 : index
    %112 = vector.load %arg4[%c128, %c0_29] : memref<320x32xf32, #tpu.memory_space<vmem>>, vector<32x32xf32>
    %cst_30 = arith.constant dense<0.000000e+00> : vector<8x32xf32>
    %113 = tpu.matmul %111, %112, %cst_30 {dimension_numbers = #tpu.dot_dimension_numbers<[1], [0], [0], [1], [0, 0, 1, 1], [], []>} : vector<8x32xf32>, vector<32x32xf32>, vector<8x32xf32> -> vector<8x32xf32>
    %114 = arith.addf %93, %113 : vector<8x32xf32>
    %115 = vector.extract_strided_slice %5 {offsets = [0, 640], sizes = [8, 128], strides = [1, 1]} : vector<8x1024xf32> to vector<8x128xf32>
    %cst_31 = arith.constant dense<0.000000e+00> : vector<8x128xf32>
    %116 = tpu.matmul %111, %6, %cst_31 {dimension_numbers = #tpu.dot_dimension_numbers<[1], [0], [0], [1], [0, 0, 1, 1], [], []>} : vector<8x32xf32>, vector<32x128xf32>, vector<8x128xf32> -> vector<8x128xf32>
    %117 = arith.addf %115, %116 : vector<8x128xf32>
    %118 = arith.negf %117 : vector<8x128xf32>
    %119 = math.exp %118 : vector<8x128xf32>
    %cst_32 = arith.constant 1.000000e+00 : f32
    %120 = vector.broadcast %cst_32 : f32 to vector<8x128xf32>
    %121 = arith.addf %120, %119 : vector<8x128xf32>
    %122 = arith.divf %120, %121 : vector<8x128xf32>
    %123 = math.tanh %117 : vector<8x128xf32>
    %124 = vector.extract_strided_slice %122 {offsets = [0, 0], sizes = [8, 32], strides = [1, 1]} : vector<8x128xf32> to vector<8x32xf32>
    %125 = vector.extract_strided_slice %122 {offsets = [0, 32], sizes = [8, 32], strides = [1, 1]} : vector<8x128xf32> to vector<8x32xf32>
    %126 = vector.extract_strided_slice %123 {offsets = [0, 64], sizes = [8, 32], strides = [1, 1]} : vector<8x128xf32> to vector<8x32xf32>
    %127 = vector.extract_strided_slice %122 {offsets = [0, 96], sizes = [8, 32], strides = [1, 1]} : vector<8x128xf32> to vector<8x32xf32>
    %128 = arith.mulf %125, %109 : vector<8x32xf32>
    %129 = arith.mulf %124, %126 : vector<8x32xf32>
    %130 = arith.addf %128, %129 : vector<8x32xf32>
    %131 = math.tanh %130 : vector<8x32xf32>
    %132 = arith.mulf %127, %131 : vector<8x32xf32>
    %c160 = arith.constant 160 : index
    %c0_33 = arith.constant 0 : index
    %133 = vector.load %arg4[%c160, %c0_33] : memref<320x32xf32, #tpu.memory_space<vmem>>, vector<32x32xf32>
    %cst_34 = arith.constant dense<0.000000e+00> : vector<8x32xf32>
    %134 = tpu.matmul %132, %133, %cst_34 {dimension_numbers = #tpu.dot_dimension_numbers<[1], [0], [0], [1], [0, 0, 1, 1], [], []>} : vector<8x32xf32>, vector<32x32xf32>, vector<8x32xf32> -> vector<8x32xf32>
    %135 = arith.addf %114, %134 : vector<8x32xf32>
    %136 = vector.extract_strided_slice %5 {offsets = [0, 768], sizes = [8, 128], strides = [1, 1]} : vector<8x1024xf32> to vector<8x128xf32>
    %cst_35 = arith.constant dense<0.000000e+00> : vector<8x128xf32>
    %137 = tpu.matmul %132, %6, %cst_35 {dimension_numbers = #tpu.dot_dimension_numbers<[1], [0], [0], [1], [0, 0, 1, 1], [], []>} : vector<8x32xf32>, vector<32x128xf32>, vector<8x128xf32> -> vector<8x128xf32>
    %138 = arith.addf %136, %137 : vector<8x128xf32>
    %139 = arith.negf %138 : vector<8x128xf32>
    %140 = math.exp %139 : vector<8x128xf32>
    %cst_36 = arith.constant 1.000000e+00 : f32
    %141 = vector.broadcast %cst_36 : f32 to vector<8x128xf32>
    %142 = arith.addf %141, %140 : vector<8x128xf32>
    %143 = arith.divf %141, %142 : vector<8x128xf32>
    %144 = math.tanh %138 : vector<8x128xf32>
    %145 = vector.extract_strided_slice %143 {offsets = [0, 0], sizes = [8, 32], strides = [1, 1]} : vector<8x128xf32> to vector<8x32xf32>
    %146 = vector.extract_strided_slice %143 {offsets = [0, 32], sizes = [8, 32], strides = [1, 1]} : vector<8x128xf32> to vector<8x32xf32>
    %147 = vector.extract_strided_slice %144 {offsets = [0, 64], sizes = [8, 32], strides = [1, 1]} : vector<8x128xf32> to vector<8x32xf32>
    %148 = vector.extract_strided_slice %143 {offsets = [0, 96], sizes = [8, 32], strides = [1, 1]} : vector<8x128xf32> to vector<8x32xf32>
    %149 = arith.mulf %146, %130 : vector<8x32xf32>
    %150 = arith.mulf %145, %147 : vector<8x32xf32>
    %151 = arith.addf %149, %150 : vector<8x32xf32>
    %152 = math.tanh %151 : vector<8x32xf32>
    %153 = arith.mulf %148, %152 : vector<8x32xf32>
    %c192 = arith.constant 192 : index
    %c0_37 = arith.constant 0 : index
    %154 = vector.load %arg4[%c192, %c0_37] : memref<320x32xf32, #tpu.memory_space<vmem>>, vector<32x32xf32>
    %cst_38 = arith.constant dense<0.000000e+00> : vector<8x32xf32>
    %155 = tpu.matmul %153, %154, %cst_38 {dimension_numbers = #tpu.dot_dimension_numbers<[1], [0], [0], [1], [0, 0, 1, 1], [], []>} : vector<8x32xf32>, vector<32x32xf32>, vector<8x32xf32> -> vector<8x32xf32>
    %156 = arith.addf %135, %155 : vector<8x32xf32>
    %157 = vector.extract_strided_slice %5 {offsets = [0, 896], sizes = [8, 128], strides = [1, 1]} : vector<8x1024xf32> to vector<8x128xf32>
    %cst_39 = arith.constant dense<0.000000e+00> : vector<8x128xf32>
    %158 = tpu.matmul %153, %6, %cst_39 {dimension_numbers = #tpu.dot_dimension_numbers<[1], [0], [0], [1], [0, 0, 1, 1], [], []>} : vector<8x32xf32>, vector<32x128xf32>, vector<8x128xf32> -> vector<8x128xf32>
    %159 = arith.addf %157, %158 : vector<8x128xf32>
    %160 = arith.negf %159 : vector<8x128xf32>
    %161 = math.exp %160 : vector<8x128xf32>
    %cst_40 = arith.constant 1.000000e+00 : f32
    %162 = vector.broadcast %cst_40 : f32 to vector<8x128xf32>
    %163 = arith.addf %162, %161 : vector<8x128xf32>
    %164 = arith.divf %162, %163 : vector<8x128xf32>
    %165 = math.tanh %159 : vector<8x128xf32>
    %166 = vector.extract_strided_slice %164 {offsets = [0, 0], sizes = [8, 32], strides = [1, 1]} : vector<8x128xf32> to vector<8x32xf32>
    %167 = vector.extract_strided_slice %164 {offsets = [0, 32], sizes = [8, 32], strides = [1, 1]} : vector<8x128xf32> to vector<8x32xf32>
    %168 = vector.extract_strided_slice %165 {offsets = [0, 64], sizes = [8, 32], strides = [1, 1]} : vector<8x128xf32> to vector<8x32xf32>
    %169 = vector.extract_strided_slice %164 {offsets = [0, 96], sizes = [8, 32], strides = [1, 1]} : vector<8x128xf32> to vector<8x32xf32>
    %170 = arith.mulf %167, %151 : vector<8x32xf32>
    %171 = arith.mulf %166, %168 : vector<8x32xf32>
    %172 = arith.addf %170, %171 : vector<8x32xf32>
    %173 = math.tanh %172 : vector<8x32xf32>
    %174 = arith.mulf %169, %173 : vector<8x32xf32>
    %c224 = arith.constant 224 : index
    %c0_41 = arith.constant 0 : index
    %175 = vector.load %arg4[%c224, %c0_41] : memref<320x32xf32, #tpu.memory_space<vmem>>, vector<32x32xf32>
    %cst_42 = arith.constant dense<0.000000e+00> : vector<8x32xf32>
    %176 = tpu.matmul %174, %175, %cst_42 {dimension_numbers = #tpu.dot_dimension_numbers<[1], [0], [0], [1], [0, 0, 1, 1], [], []>} : vector<8x32xf32>, vector<32x32xf32>, vector<8x32xf32> -> vector<8x32xf32>
    %177 = arith.addf %156, %176 : vector<8x32xf32>
    %c0_43 = arith.constant 0 : index
    %c0_44 = arith.constant 0 : index
    %178 = vector.load %arg5[%c0_43, %c0_44] : memref<9x32xf32, #tpu.memory_space<vmem>>, vector<1x32xf32>
    %179 = vector.broadcast %178 : vector<1x32xf32> to vector<8x32xf32>
    %180 = arith.addf %177, %179 : vector<8x32xf32>
    %c1 = arith.constant 1 : index
    %c0_45 = arith.constant 0 : index
    %181 = vector.load %arg5[%c1, %c0_45] : memref<9x32xf32, #tpu.memory_space<vmem>>, vector<1x32xf32>
    %c2 = arith.constant 2 : index
    %c0_46 = arith.constant 0 : index
    %182 = vector.load %arg5[%c2, %c0_46] : memref<9x32xf32, #tpu.memory_space<vmem>>, vector<1x32xf32>
    %cst_47 = arith.constant dense<0.000000e+00> : vector<32xf32>
    %183 = vector.multi_reduction <add>, %180, %cst_47 [0] : vector<8x32xf32> to vector<32xf32>
    %184 = vector.shape_cast %183 : vector<32xf32> to vector<1x32xf32>
    %cst_48 = arith.constant 8.000000e+00 : f32
    %185 = vector.broadcast %cst_48 : f32 to vector<1x32xf32>
    %186 = arith.divf %184, %185 : vector<1x32xf32>
    %187 = vector.broadcast %186 : vector<1x32xf32> to vector<8x32xf32>
    %188 = arith.subf %180, %187 : vector<8x32xf32>
    %189 = arith.mulf %188, %188 : vector<8x32xf32>
    %cst_49 = arith.constant dense<0.000000e+00> : vector<32xf32>
    %190 = vector.multi_reduction <add>, %189, %cst_49 [0] : vector<8x32xf32> to vector<32xf32>
    %191 = vector.shape_cast %190 : vector<32xf32> to vector<1x32xf32>
    %cst_50 = arith.constant 8.000000e+00 : f32
    %192 = vector.broadcast %cst_50 : f32 to vector<1x32xf32>
    %193 = arith.divf %191, %192 : vector<1x32xf32>
    %194 = vector.broadcast %186 : vector<1x32xf32> to vector<8x32xf32>
    %195 = arith.subf %180, %194 : vector<8x32xf32>
    %196 = vector.broadcast %181 : vector<1x32xf32> to vector<8x32xf32>
    %197 = arith.mulf %196, %195 : vector<8x32xf32>
    %cst_51 = arith.constant 9.99999974E-6 : f32
    %198 = vector.broadcast %cst_51 : f32 to vector<1x32xf32>
    %199 = arith.addf %193, %198 : vector<1x32xf32>
    %200 = math.rsqrt %199 : vector<1x32xf32>
    %201 = vector.broadcast %200 : vector<1x32xf32> to vector<8x32xf32>
    %202 = arith.mulf %197, %201 : vector<8x32xf32>
    %203 = vector.broadcast %182 : vector<1x32xf32> to vector<8x32xf32>
    %204 = arith.addf %202, %203 : vector<8x32xf32>
    %c256 = arith.constant 256 : index
    %c0_52 = arith.constant 0 : index
    %205 = vector.load %arg4[%c256, %c0_52] : memref<320x32xf32, #tpu.memory_space<vmem>>, vector<32x32xf32>
    %cst_53 = arith.constant dense<0.000000e+00> : vector<8x32xf32>
    %206 = tpu.matmul %204, %205, %cst_53 {dimension_numbers = #tpu.dot_dimension_numbers<[1], [0], [0], [1], [0, 0, 1, 1], [], []>} : vector<8x32xf32>, vector<32x32xf32>, vector<8x32xf32> -> vector<8x32xf32>
    %c3 = arith.constant 3 : index
    %c0_54 = arith.constant 0 : index
    %207 = vector.load %arg5[%c3, %c0_54] : memref<9x32xf32, #tpu.memory_space<vmem>>, vector<1x32xf32>
    %208 = vector.broadcast %207 : vector<1x32xf32> to vector<8x32xf32>
    %209 = arith.addf %206, %208 : vector<8x32xf32>
    %c4 = arith.constant 4 : index
    %c0_55 = arith.constant 0 : index
    %210 = vector.load %arg5[%c4, %c0_55] : memref<9x32xf32, #tpu.memory_space<vmem>>, vector<1x32xf32>
    %c5 = arith.constant 5 : index
    %c0_56 = arith.constant 0 : index
    %211 = vector.load %arg5[%c5, %c0_56] : memref<9x32xf32, #tpu.memory_space<vmem>>, vector<1x32xf32>
    %cst_57 = arith.constant dense<0.000000e+00> : vector<32xf32>
    %212 = vector.multi_reduction <add>, %209, %cst_57 [0] : vector<8x32xf32> to vector<32xf32>
    %213 = vector.shape_cast %212 : vector<32xf32> to vector<1x32xf32>
    %cst_58 = arith.constant 8.000000e+00 : f32
    %214 = vector.broadcast %cst_58 : f32 to vector<1x32xf32>
    %215 = arith.divf %213, %214 : vector<1x32xf32>
    %216 = vector.broadcast %215 : vector<1x32xf32> to vector<8x32xf32>
    %217 = arith.subf %209, %216 : vector<8x32xf32>
    %218 = arith.mulf %217, %217 : vector<8x32xf32>
    %cst_59 = arith.constant dense<0.000000e+00> : vector<32xf32>
    %219 = vector.multi_reduction <add>, %218, %cst_59 [0] : vector<8x32xf32> to vector<32xf32>
    %220 = vector.shape_cast %219 : vector<32xf32> to vector<1x32xf32>
    %cst_60 = arith.constant 8.000000e+00 : f32
    %221 = vector.broadcast %cst_60 : f32 to vector<1x32xf32>
    %222 = arith.divf %220, %221 : vector<1x32xf32>
    %223 = vector.broadcast %215 : vector<1x32xf32> to vector<8x32xf32>
    %224 = arith.subf %209, %223 : vector<8x32xf32>
    %225 = vector.broadcast %210 : vector<1x32xf32> to vector<8x32xf32>
    %226 = arith.mulf %225, %224 : vector<8x32xf32>
    %cst_61 = arith.constant 9.99999974E-6 : f32
    %227 = vector.broadcast %cst_61 : f32 to vector<1x32xf32>
    %228 = arith.addf %222, %227 : vector<1x32xf32>
    %229 = math.rsqrt %228 : vector<1x32xf32>
    %230 = vector.broadcast %229 : vector<1x32xf32> to vector<8x32xf32>
    %231 = arith.mulf %226, %230 : vector<8x32xf32>
    %232 = vector.broadcast %211 : vector<1x32xf32> to vector<8x32xf32>
    %233 = arith.addf %231, %232 : vector<8x32xf32>
    %c288 = arith.constant 288 : index
    %c0_62 = arith.constant 0 : index
    %234 = vector.load %arg4[%c288, %c0_62] : memref<320x32xf32, #tpu.memory_space<vmem>>, vector<32x32xf32>
    %cst_63 = arith.constant dense<0.000000e+00> : vector<8x32xf32>
    %235 = tpu.matmul %233, %234, %cst_63 {dimension_numbers = #tpu.dot_dimension_numbers<[1], [0], [0], [1], [0, 0, 1, 1], [], []>} : vector<8x32xf32>, vector<32x32xf32>, vector<8x32xf32> -> vector<8x32xf32>
    %c6 = arith.constant 6 : index
    %c0_64 = arith.constant 0 : index
    %236 = vector.load %arg5[%c6, %c0_64] : memref<9x32xf32, #tpu.memory_space<vmem>>, vector<1x32xf32>
    %237 = vector.broadcast %236 : vector<1x32xf32> to vector<8x32xf32>
    %238 = arith.addf %235, %237 : vector<8x32xf32>
    %c7 = arith.constant 7 : index
    %c0_65 = arith.constant 0 : index
    %239 = vector.load %arg5[%c7, %c0_65] : memref<9x32xf32, #tpu.memory_space<vmem>>, vector<1x32xf32>
    %c8_66 = arith.constant 8 : index
    %c0_67 = arith.constant 0 : index
    %240 = vector.load %arg5[%c8_66, %c0_67] : memref<9x32xf32, #tpu.memory_space<vmem>>, vector<1x32xf32>
    %cst_68 = arith.constant dense<0.000000e+00> : vector<32xf32>
    %241 = vector.multi_reduction <add>, %238, %cst_68 [0] : vector<8x32xf32> to vector<32xf32>
    %242 = vector.shape_cast %241 : vector<32xf32> to vector<1x32xf32>
    %cst_69 = arith.constant 8.000000e+00 : f32
    %243 = vector.broadcast %cst_69 : f32 to vector<1x32xf32>
    %244 = arith.divf %242, %243 : vector<1x32xf32>
    %245 = vector.broadcast %244 : vector<1x32xf32> to vector<8x32xf32>
    %246 = arith.subf %238, %245 : vector<8x32xf32>
    %247 = arith.mulf %246, %246 : vector<8x32xf32>
    %cst_70 = arith.constant dense<0.000000e+00> : vector<32xf32>
    %248 = vector.multi_reduction <add>, %247, %cst_70 [0] : vector<8x32xf32> to vector<32xf32>
    %249 = vector.shape_cast %248 : vector<32xf32> to vector<1x32xf32>
    %cst_71 = arith.constant 8.000000e+00 : f32
    %250 = vector.broadcast %cst_71 : f32 to vector<1x32xf32>
    %251 = arith.divf %249, %250 : vector<1x32xf32>
    %252 = vector.broadcast %244 : vector<1x32xf32> to vector<8x32xf32>
    %253 = arith.subf %238, %252 : vector<8x32xf32>
    %254 = vector.broadcast %239 : vector<1x32xf32> to vector<8x32xf32>
    %255 = arith.mulf %254, %253 : vector<8x32xf32>
    %cst_72 = arith.constant 9.99999974E-6 : f32
    %256 = vector.broadcast %cst_72 : f32 to vector<1x32xf32>
    %257 = arith.addf %251, %256 : vector<1x32xf32>
    %258 = math.rsqrt %257 : vector<1x32xf32>
    %259 = vector.broadcast %258 : vector<1x32xf32> to vector<8x32xf32>
    %260 = arith.mulf %255, %259 : vector<8x32xf32>
    %261 = vector.broadcast %240 : vector<1x32xf32> to vector<8x32xf32>
    %262 = arith.addf %260, %261 : vector<8x32xf32>
    %263 = vector.extract_strided_slice %262 {offsets = [0, 0], sizes = [8, 8], strides = [1, 1]} : vector<8x32xf32> to vector<8x8xf32>
    %cst_73 = arith.constant dense<0xFF800000> : vector<8xf32>
    %264 = vector.multi_reduction <maximumf>, %263, %cst_73 [1] : vector<8x8xf32> to vector<8xf32>
    %265 = vector.shape_cast %264 : vector<8xf32> to vector<8x1xf32>
    %266 = vector.broadcast %265 : vector<8x1xf32> to vector<8x8xf32>
    %267 = arith.subf %263, %266 : vector<8x8xf32>
    %268 = math.exp %267 : vector<8x8xf32>
    %cst_74 = arith.constant dense<0.000000e+00> : vector<8xf32>
    %269 = vector.multi_reduction <add>, %268, %cst_74 [1] : vector<8x8xf32> to vector<8xf32>
    %270 = vector.shape_cast %269 : vector<8xf32> to vector<8x1xf32>
    %271 = vector.broadcast %270 : vector<8x1xf32> to vector<8x8xf32>
    %272 = arith.divf %268, %271 : vector<8x8xf32>
    %c0_75 = arith.constant 0 : index
    %c0_76 = arith.constant 0 : index
    %273 = vector.load %arg6[%c0_75, %c0_76] : memref<8x8xf32, #tpu.memory_space<vmem>>, vector<8x8xf32>
    tpu.vector_store %arg6[%c0_75, %c0_76], %272 {strides = array<i32>} : memref<8x8xf32, #tpu.memory_space<vmem>>, vector<8x8xf32>,
    return
  }
}

</mosaic_0001>

<bundles_post_ra>
// kernel: model_har_forward.1
= control target key start
LH: loop header
LB: loop body
LE: loop exit
PB: predicated region body
PF: predicated region fallthrough
CT: control target
= control target key end

     0   :  { %v2704_v7 = vmov 0.0   ;;  %s3291_s0 = inlined_call_operand.vmem [shape: f32[8,48], index: 0, kind: input, shape index: {}]   ;;  %s3292_s1 = inlined_call_operand.vmem [shape: f32[49,1024], index: 1, kind: input, shape index: {}]   ;;  %s3293_s2 = inlined_call_operand.vmem [shape: f32[32,128], index: 2, kind: input, shape index: {}]   ;;  %s3294_s3 = inlined_call_operand.vmem [shape: f32[16,32], index: 3, kind: input, shape index: {}]   ;;  %s3295_s4 = inlined_call_operand.vmem [shape: f32[320,32], index: 4, kind: input, shape index: {}]   ;;  %s3296_s5 = inlined_call_operand.vmem [shape: f32[9,32], index: 5, kind: input, shape index: {}]   ;;  %s3297_s6 = inlined_call_operand.hbm [shape: f32[8,8], index: 6, kind: output, shape index: {}]  }
   0x1   :  { %v26_v0 = vld [vmem:[%s3292_s1 + $0x8] sm:$0xff]  ;;  %v25_v2 = vld [vmem:[%s3292_s1] sm:$0xff]  ;;  %186 = vmatprep.mubr.f32.mxu0 %v2704_v7  ;;  %257 = vmatprep.mubr.f32.mxu1 %v2704_v7 }
   0x2   :  { %v34_v1 = vld [vmem:[%s3292_s1 + $0x48] sm:$0xff]  ;;  %v33_v4 = vld [vmem:[%s3292_s1 + $0x40] sm:$0xff] }
   0x3   :  { %v2444_v3 = vpack.c.bf16 %v34_v1, %v26_v0  ;;  %v42_v5 = vld [vmem:[%s3292_s1 + $0x88] sm:$0xff]  ;;  %v2446_v8 = vpack.c.bf16 %v33_v4, %v25_v2  ;;  %v41_v10 = vld [vmem:[%s3292_s1 + $0x80] sm:$0xff] }
   0x4   :  { %v50_v6 = vld [vmem:[%s3292_s1 + $0xc8] sm:$0xff]  ;;  %v49_v11 = vld [vmem:[%s3292_s1 + $0xc0] sm:$0xff] }
   0x5   :  { %v2448_v9 = vpack.c.bf16 %v50_v6, %v42_v5  ;;  %v58_v12 = vld [vmem:[%s3292_s1 + $0x108] sm:$0xff]  ;;  %2445 = vmatprep.subr.bf16.mxu0 %v2444_v3  ;;  %v2450_v14 = vpack.c.bf16 %v49_v11, %v41_v10  ;;  %v57_v16 = vld [vmem:[%s3292_s1 + $0x100] sm:$0xff] }
   0x6   :  { %v66_v13 = vld [vmem:[%s3292_s1 + $0x148] sm:$0xff]  ;;  %2447 = vmatpush1.bf16.msra.mxu0 %v2446_v8  ;;  %v65_v17 = vld [vmem:[%s3292_s1 + $0x140] sm:$0xff] }
   0x7   :  { %2449 = vmatprep.subr.bf16.mxu0 %v2448_v9  ;;  %v2452_v15 = vpack.c.bf16 %v66_v13, %v58_v12  ;;  %v30_v18 = vld [vmem:[%s3292_s1 + $0x28] sm:$0xff]  ;;  %v2454_v20 = vpack.c.bf16 %v65_v17, %v57_v16  ;;  %v29_v22 = vld [vmem:[%s3292_s1 + $0x20] sm:$0xff] }
   0x8   :  { %v38_v19 = vld [vmem:[%s3292_s1 + $0x68] sm:$0xff]  ;;  %v37_v23 = vld [vmem:[%s3292_s1 + $0x60] sm:$0xff] }
   0x9   :  { %v2468_v21 = vpack.c.bf16 %v38_v19, %v30_v18  ;;  %v46_v24 = vld [vmem:[%s3292_s1 + $0xa8] sm:$0xff] }
   0xa   :  { %2451 = vmatpush1.bf16.msra.mxu0 %v2450_v14  ;;  %v54_v25 = vld [vmem:[%s3292_s1 + $0xe8] sm:$0xff] }
   0xb   :  { %2453 = vmatprep.subr.bf16.mxu0 %v2452_v15 }
   0xc   :  { %11 = vsyncpa [#allocation3], 0  ;;  %v2804_v26 = vld [vmem:[%s3291_s0] sm:$0xff]  ;;  %vm118_vm0 = vcmask 392192   ;;  %v2470_v27 = vpack.c.bf16 %v37_v23, %v29_v22  ;;  %v2472_v28 = vpack.c.bf16 %v54_v25, %v46_v24  ;;  %v62_v31 = vld [vmem:[%s3292_s1 + $0x128] sm:$0xff]  ;;  %v2705_v41 = vmov 0.0|0.0  }
   0xd   :  { %v45_v29 = vld [vmem:[%s3292_s1 + $0xa0] sm:$0xff]  ;;  %v70_v32 = vld [vmem:[%s3292_s1 + $0x168] sm:$0xff]  ;;  %v408_v42 = vld [vmem:[%s3293_s2 + $0x10] sm:$0xff]  ;;  %vm2706_vm1 = vmmov 0   ;;  %vm412_vm2 = vcmask 261120   ;;  %v78_v48 = vlaneseq  ;;  %s2707_s11 = smov 64  }
   0xe   :  { %2455 = vmatpush1.bf16.msra.mxu0 %v2454_v20  ;;  %v53_v30 = vld [vmem:[%s3292_s1 + $0xe0] sm:$0xff]  ;;  %v2476_v34 = vpack.c.bf16 %v70_v32, %v62_v31  ;;  %v407_v39 = vld [vmem:[%s3293_s2 + $0x8] sm:$0xff]  ;;  %v409_v43 = vld [vmem:[%s3293_s2 + $0x18] sm:$0xff]  ;;  %s2708_s14 = smov 32   ;;  %vm2088_vm3 = vcmask 64512  }
   0xf   :  { %2469 = vmatprep.subr.bf16.mxu0 %v2468_v21  ;;  %v2474_v33 = vpack.c.bf16 %v53_v30, %v45_v29  ;;  %v61_v35 = vld [vmem:[%s3292_s1 + $0x120] sm:$0xff]  ;;  %v2845_v44 = vpack.c.bf16 %v409_v43, %v408_v42  ;;  %v2860_v49 = vshrl.u32 %v78_v48, 7  ;;  %v411_v62 = vld [vmem:[%s3294_s3 + $0x8] sm:$0xff]  ;;  %v28_v10 = vld [vmem:[%s3292_s1 + $0x18] sm:$0xff] }
  0x10   :  { %v69_v36 = vld [vmem:[%s3292_s1 + $0x160] sm:$0xff]  ;;  %v36_v11 = vld [vmem:[%s3292_s1 + $0x58] sm:$0xff]  ;;  %v27_v12 = vld [vmem:[%s3292_s1 + $0x10] sm:$0xff] }
  0x11   :  { %2117 = vmatmul.mubr.msk.f32.vlgmr.msra.gmra.mrb[0].mxu0 %vm118_vm0, %v2804_v26  ;;  %v2478_v37 = vpack.c.bf16 %v69_v36, %v61_v35  ;;  %v406_v38 = vld [vmem:[%s3293_s2] sm:$0xff]  ;;  %v80_v53 = vsub.s32 0, %v2860_v49  ;;  %v2456_v13 = vpack.c.bf16 %v36_v11, %v28_v10  ;;  %v35_v14 = vld [vmem:[%s3292_s1 + $0x50] sm:$0xff]  ;;  %v44_v15 = vld [vmem:[%s3292_s1 + $0x98] sm:$0xff] }
  0x12   :  { %2471 = vmatpush1.bf16.msra.mxu0 %v2470_v27  ;;  %328 = vmatprep.mubr.f32.mxu0 %v2704_v7  ;;  %v2833_v40 = vpack.c.bf16 %v407_v39, %v406_v38  ;;  %v410_v45 = vld [vmem:[%s3294_s3] sm:$0xff]  ;;  %v52_v16 = vld [vmem:[%s3292_s1 + $0xd8] sm:$0xff]  ;;  %v2458_v17 = vpack.c.bf16 %v35_v14, %v27_v12  ;;  %v43_v19 = vld [vmem:[%s3292_s1 + $0x90] sm:$0xff] }
  0x13   :  { %2473 = vmatprep.subr.bf16.mxu0 %v2472_v28  ;;  %v2115_v50 = vld [vmem:[%s3292_s1 + $0x180] ss:$8 sm:$0xf]  ;;  %v2460_v18 = vpack.c.bf16 %v52_v16, %v44_v15  ;;  %2457 = vmatprep.subr.bf16.mxu1 %v2456_v13 }
  0x14   :  { %v2116_v51 = vld [vmem:[%s3292_s1 + $0x180] ss:$8 sm:$0xf0]  ;;  %2459 = vmatpush1.bf16.msra.mxu1 %v2458_v17 }
  0x15   :  { %v2868_v52 = vor.u32 %v2116_v51, %v2115_v50  ;;  %v51_v20 = vld [vmem:[%s3292_s1 + $0xd0] sm:$0xff]  ;;  %v60_v21 = vld [vmem:[%s3292_s1 + $0x118] sm:$0xff]  ;;  %2461 = vmatprep.subr.bf16.mxu1 %v2460_v18 }
  0x16   :  { %2475 = vmatpush1.bf16.msra.mxu0 %v2474_v33  ;;  %v68_v22 = vld [vmem:[%s3292_s1 + $0x158] sm:$0xff]  ;;  %v2462_v23 = vpack.c.bf16 %v51_v20, %v43_v19  ;;  %v59_v25 = vld [vmem:[%s3292_s1 + $0x110] sm:$0xff] }
  0x17   :  { %2477 = vmatprep.subr.bf16.mxu0 %v2476_v34  ;;  %v81_v56 = vrot.slane %v2868_v52, %v80_v53  ;;  %v2464_v24 = vpack.c.bf16 %v68_v22, %v60_v21  ;;  %v67_v27 = vld [vmem:[%s3292_s1 + $0x150] sm:$0xff]  ;;  %v32_v28 = vld [vmem:[%s3292_s1 + $0x38] sm:$0xff] }
  0x18   :  { %v40_v29 = vld [vmem:[%s3292_s1 + $0x78] sm:$0xff]  ;;  %2463 = vmatpush1.bf16.msra.mxu1 %v2462_v23  ;;  %v2466_v30 = vpack.c.bf16 %v67_v27, %v59_v25  ;;  %v31_v32 = vld [vmem:[%s3292_s1 + $0x30] sm:$0xff]  ;;  %v619_v23 = vld [vmem:[%s3295_s4 + $0x20] sm:$0xff] }
  0x19   :  { %2465 = vmatprep.subr.bf16.mxu1 %v2464_v24  ;;  %v2480_v31 = vpack.c.bf16 %v40_v29, %v32_v28  ;;  %v39_v33 = vld [vmem:[%s3292_s1 + $0x70] sm:$0xff]  ;;  %v48_v35 = vld [vmem:[%s3292_s1 + $0xb8] sm:$0xff]  ;;  %v620_v24 = vld [vmem:[%s3295_s4 + $0x28] sm:$0xff] }
  0x1a   :  { %2479 = vmatpush1.bf16.msra.mxu0 %v2478_v37  ;;  %v56_v36 = vld [vmem:[%s3292_s1 + $0xf8] sm:$0xff]  ;;  %v2482_v37 = vpack.c.bf16 %v39_v33, %v31_v32  ;;  %v47_v39 = vld [vmem:[%s3292_s1 + $0xb0] sm:$0xff]  ;;  %v2505_v27 = vpack.c.bf16 %v620_v24, %v619_v23  ;;  %v88_v33 = vsub.s32 2, %v2860_v49 }
  0x1b   :  { %2492 = vmatprep.subr.bf16.mxu0 %v2705_v41  ;;  %v2484_v38 = vpack.c.bf16 %v56_v36, %v48_v35  ;;  %v55_v42 = vld [vmem:[%s3292_s1 + $0xf0] sm:$0xff]  ;;  %v64_v43 = vld [vmem:[%s3292_s1 + $0x138] sm:$0xff] }
  0x1c   :  { %2467 = vmatpush1.bf16.msra.mxu1 %v2466_v30  ;;  %v63_v50 = vld [vmem:[%s3292_s1 + $0x130] sm:$0xff] }
  0x1d   :  { %2119 = vmatmul.mubr.msk.f32.vlgmr.msra.gmra.mrb[2].mxu0 %vm118_vm0, %v2804_v26  ;;  %2481 = vmatprep.subr.bf16.mxu1 %v2480_v31  ;;  %v71_v51 = vld [vmem:[%s3292_s1 + $0x170] sm:$0xff] }
  0x1e   :  { %2494 = vmatpush3.bf16.msra.mxu0 %v2833_v40  ;;  %2254 = vmatprep.mubr.msk.f32.mxu0 %vm2706_vm1, %v2704_v7  ;;  %v2490_v53 = vpack.c.bf16 %v71_v51, %v63_v50  ;;  %v621_v25 = vld [vmem:[%s3295_s4 + $0x30] sm:$0xff] }
  0x1f   :  { %2495 = vmatprep.subr.bf16.mxu0 %v2705_v41  ;;  %2118 = vmatmul.mubr.msk.f32.vlgmr.msra.gmra.mrb[0].mxu1 %vm118_vm0, %v2804_v26 }
  0x20   :  { %2483 = vmatpush1.bf16.msra.mxu1 %v2482_v37  ;;  %399 = vmatprep.mubr.f32.mxu1 %v2704_v7  ;;  %v89_v37 = vrot.slane %v2868_v52, %v88_v33 }
  0x21   :  { %2485 = vmatprep.subr.bf16.mxu1 %v2484_v38 }
  0x22   :  { %2497 = vmatpush3.bf16.msra.mxu0 %v2845_v44 }
  0x23   :  { %2504 = vmatprep.subr.bf16.mxu0 %v2705_v41 }
  0x25   :  { %2255 = vmatmul.mubr.msk.f32.vlgmr.msra.gmra.mrb[4].mxu0 %vm412_vm2, %v410_v45  ;;  %v72_v45 = vld [vmem:[%s3292_s1 + $0x178] sm:$0xff] }
  0x26   :  { %2276 = vmatprep.mubr.msk.f32.mxu0 %vm2706_vm1, %v2704_v7  ;;  %v2488_v48 = vpack.c.bf16 %v72_v45, %v64_v43  ;;  %2506 = vmatpush3.bf16.msra.mxu0 %v2505_v27 }
  0x27   :  { %2507 = vmatprep.subr.bf16.mxu0 %v2705_v41 }
  0xe4   :  { %v188_v46 = vpop.f32.mrb[0].mxu0 }
  0xe5   :  { %v2858_v47 = vpop.f32.mrb[1].mxu0  ;;  %v189_v57 = vadd.f32 %v188_v46, %v81_v56  ;;  %v2486_v46 = vpack.c.bf16 %v55_v42, %v47_v39 }
  0xe7   :  { %2487 = vmatpush1.bf16.msra.mxu1 %v2486_v46 }
  0xe8   :  { %2489 = vmatprep.subr.bf16.mxu1 %v2488_v48 }
  0xeb   :  { %2491 = vmatpush1.bf16.msra.mxu1 %v2490_v53 }
  0xec   :  { %2498 = vmatprep.subr.bf16.mxu1 %v2705_v41 }
  0xee   :  { %2120 = vmatmul.mubr.msk.f32.vlgmr.msra.gmra.mrb[2].mxu1 %vm118_vm0, %v2804_v26  ;;  %v515_v26 = vld [vmem:[%s3295_s4] sm:$0xff] }
  0xef   :  { %2500 = vmatpush3.bf16.msra.mxu1 %v2833_v40  ;;  %2265 = vmatprep.mubr.msk.f32.mxu1 %vm2706_vm1, %v2704_v7 }
  0xf0   :  { %v2871_v54 = vpop.f32.mrb[2].mxu0  ;;  %2501 = vmatprep.subr.bf16.mxu1 %v2705_v41 }
  0xf1   :  { %v2873_v55 = vpop.f32.mrb[3].mxu0 }
  0xf3   :  { %2503 = vmatpush3.bf16.msra.mxu1 %v2845_v44 }
  0xf4   :  { %2510 = vmatprep.subr.bf16.mxu1 %v2705_v41 }
  0xf8   :  { %v482_v58 = vpop.f32.mrb[4].mxu0 }
  0xf9   :  { %v486_v59 = vadd.f32 %v482_v58, %v189_v57  ;;  %v2256_v60 = vpop.f32.mrb[5].mxu0  ;;  %v2976_v58 = vpop.f32.mrb[0].mxu1 }
  0xfa   :  { %v516_v60 = vld [vmem:[%s3295_s4 + $0x8] sm:$0xff]  ;;  %v260_v38 = vadd.f32 %v2976_v58, %v89_v37  ;;  %v96_v37 = vsub.s32 4, %v2860_v49 }
  0xfb   :  { %2606 = vtanh.f32 %v486_v59  ;;  %v2122_v63 = vmul.f32 -1.442695, %v486_v59  ;;  %v2978_v59 = vpop.f32.mrb[1].mxu1 }
  0xfd   :  { %2608 = vpow2.f32 %v2122_v63  ;;  %v2511_v63 = vpack.c.bf16 %v516_v60, %v515_v26  ;;  %v863_v60 = vld [vmem:[%s3295_s4 + $0x40] sm:$0xff] }
 0x105   :  { %v2607_v61 = vpop.eup %2606 }
 0x106   :  { %500 = vrot.lane.b32.xlu0 %v2607_v61, %s2707_s11 }
 0x107   :  { %v2609_v0 = vpop.eup %2608 }
 0x108   :  { %v490_v1 = vadd.f32 1.0, %v2609_v0  ;;  %v517_v0 = vld [vmem:[%s3295_s4 + $0x10] sm:$0xff] }
 0x10a   :  { %495 = vrot.lane.b32.xlu0 %v411_v62, %s2708_s14  ;;  %2610 = vrcp.f32 %v490_v1  ;;  %v518_v1 = vld [vmem:[%s3295_s4 + $0x18] sm:$0xff] }
 0x114   :  { %v2881_v2 = vpop.eup %2610 }
 0x178   :  { %v501_v3 = vpop.permute.xlu0 %500 }
 0x179   :  { %v503_v4 = vmul.f32 %v2881_v2, %v501_v3  ;;  %v2514_v3 = vpack.c.bf16 %v518_v1, %v517_v0  ;;  %v865_v0 = vld [vmem:[%s3295_s4 + $0x50] sm:$0xff] }
 0x17b   :  { %505 = vrot.lane.b32.xlu1 %v503_v4, %s2708_s14  ;;  %v84_v4 = vsub.s32 1, %v2860_v49 }
 0x17c   :  { %v496_v5 = vpop.permute.xlu0 %495 }
 0x17d   :  { %v498_v6 = vmul.f32 %v2881_v2, %v496_v5  ;;  %v85_v5 = vrot.slane %v2868_v52, %v84_v4 }
 0x1c1   :  { %v2986_v61 = vpop.f32.mrb[2].mxu1 }
 0x1c2   :  { %v2988_v62 = vpop.f32.mrb[3].mxu1 }
 0x1ed   :  { %v506_v8 = vpop.permute.xlu1 %505 }
 0x1ee   :  { %v2886_v9 = vadd.f32 %v506_v8, %v498_v6  ;;  %v191_v6 = vadd.f32 %v2858_v47, %v85_v5 }
 0x1f0   :  { %2612 = vtanh.f32 %v2886_v9 }
 0x1fa   :  { %v2613_v34 = vpop.eup %2612 }
 0x1fb   :  { %511 = vrot.lane.b32.xlu1 %v2613_v34, %s2707_s11 }
 0x26d   :  { %v512_v56 = vpop.permute.xlu1 %511 }
 0x26e   :  { %v514_v57 = vmul.f32 %v2881_v2, %v512_v56 }
 0x270   :  { %520 = vrot.lane.b32.xlu0 %v514_v57, %s2708_s14 }
 0x2e2   :  { %v521_v2 = vpop.permute.xlu0 %520 }
 0x2e3   :  { %2266 = vmatmul.mubr.msk.f32.vlgmr.msra.gmra.mrb[4].mxu1 %vm412_vm2, %v521_v2 }
 0x2e4   :  { %2512 = vmatpush3.bf16.msra.mxu1 %v2511_v63  ;;  %2287 = vmatprep.mubr.msk.f32.mxu1 %vm2706_vm1, %v2704_v7  ;;  %v864_v63 = vld [vmem:[%s3295_s4 + $0x48] sm:$0xff] }
 0x2e5   :  { %2513 = vmatprep.subr.bf16.mxu1 %v2705_v41  ;;  %v2523_v1 = vpack.c.bf16 %v864_v63, %v863_v60 }
 0x2e8   :  { %2515 = vmatpush3.bf16.msra.mxu1 %v2514_v3 }
 0x2e9   :  { %2522 = vmatprep.subr.bf16.mxu1 %v2705_v41 }
 0x2eb   :  { %2288 = vmatmul.mubr.msk.f32.vlgmr.msra.gmra.mrb[6].mxu1 %vm412_vm2, %v521_v2  ;;  %v866_v2 = vld [vmem:[%s3295_s4 + $0x58] sm:$0xff] }
 0x2ec   :  { %2309 = vmatprep.mubr.msk.f32.mxu1 %vm2706_vm1, %v2704_v7  ;;  %2524 = vmatpush3.bf16.msra.mxu1 %v2523_v1  ;;  %v2526_v3 = vpack.c.bf16 %v866_v2, %v865_v0  ;;  %v1213_v1 = vld [vmem:[%s3295_s4 + $0x80] sm:$0xff]  ;;  %v1214_v2 = vld [vmem:[%s3295_s4 + $0x88] sm:$0xff] }
 0x2ed   :  { %2525 = vmatprep.subr.bf16.mxu1 %v2705_v41 }
 0x2f0   :  { %2527 = vmatpush3.bf16.msra.mxu1 %v2526_v3  ;;  %v1215_v3 = vld [vmem:[%s3295_s4 + $0x90] sm:$0xff] }
 0x2f1   :  { %2534 = vmatprep.subr.bf16.mxu1 %v2705_v41 }
 0x3b6   :  { %v590_v8 = vpop.f32.mrb[4].mxu1 }
 0x3b7   :  { %v594_v10 = vadd.f32 %v590_v8, %v191_v6  ;;  %v2267_v11 = vpop.f32.mrb[5].mxu1 }
 0x3b9   :  { %2614 = vtanh.f32 %v594_v10  ;;  %v2124_v15 = vmul.f32 -1.442695, %v594_v10  ;;  %v92_v10 = vsub.s32 3, %v2860_v49 }
 0x3bb   :  { %2616 = vpow2.f32 %v2124_v15  ;;  %v93_v11 = vrot.slane %v2868_v52, %v92_v10 }
 0x3be   :  { %v764_v12 = vpop.f32.mrb[6].mxu1 }
 0x3bf   :  { %v2289_v13 = vpop.f32.mrb[7].mxu1 }
 0x3c3   :  { %v2615_v14 = vpop.eup %2614 }
 0x3c4   :  { %604 = vrot.lane.b32.xlu1 %v2615_v14, %s2707_s11 }
 0x3c5   :  { %v2617_v16 = vpop.eup %2616 }
 0x3c6   :  { %v598_v17 = vadd.f32 1.0, %v2617_v16 }
 0x3c8   :  { %2618 = vrcp.f32 %v598_v17 }
 0x3d2   :  { %v2619_v18 = vpop.eup %2618 }
 0x3d3   :  { %v602_v47 = vmul.f32 %v2619_v18, %v2886_v9  ;;  %v622_v9 = vld [vmem:[%s3295_s4 + $0x38] sm:$0xff] }
 0x3d4   :  { %v2508_v28 = vpack.c.bf16 %v622_v9, %v621_v25  ;;  %v1038_v9 = vld [vmem:[%s3295_s4 + $0x60] sm:$0xff] }
 0x3d6   :  { %2509 = vmatpush3.bf16.msra.mxu0 %v2508_v28  ;;  %v1039_v28 = vld [vmem:[%s3295_s4 + $0x68] sm:$0xff] }
 0x3d7   :  { %2516 = vmatprep.subr.bf16.mxu0 %v2705_v41 }
 0x436   :  { %v605_v19 = vpop.permute.xlu1 %604 }
 0x437   :  { %v607_v20 = vmul.f32 %v2619_v18, %v605_v19 }
 0x439   :  { %609 = vrot.lane.b32.xlu0 %v607_v20, %s2708_s14 }
 0x4ab   :  { %v610_v21 = vpop.permute.xlu0 %609 }
 0x4ac   :  { %v612_v22 = vadd.f32 %v610_v21, %v602_v47 }
 0x4ae   :  { %2620 = vtanh.f32 %v612_v22 }
 0x4b8   :  { %v2621_v29 = vpop.eup %2620 }
 0x4b9   :  { %615 = vrot.lane.b32.xlu1 %v2621_v29, %s2707_s11  ;;  %v1040_v29 = vld [vmem:[%s3295_s4 + $0x70] sm:$0xff] }
 0x52b   :  { %v616_v30 = vpop.permute.xlu1 %615 }
 0x52c   :  { %v618_v31 = vmul.f32 %v2619_v18, %v616_v30  ;;  %v2535_v30 = vpack.c.bf16 %v1039_v28, %v1038_v9 }
 0x52e   :  { %624 = vrot.lane.b32.xlu0 %v618_v31, %s2708_s14  ;;  %v1041_v31 = vld [vmem:[%s3295_s4 + $0x78] sm:$0xff] }
 0x5a0   :  { %v625_v32 = vpop.permute.xlu0 %624 }
 0x5a1   :  { %2277 = vmatmul.mubr.msk.f32.vlgmr.msra.gmra.mrb[6].mxu0 %vm412_vm2, %v625_v32 }
 0x5a2   :  { %2518 = vmatpush3.bf16.msra.mxu0 %v2833_v40  ;;  %2298 = vmatprep.mubr.msk.f32.mxu0 %vm2706_vm1, %v2704_v7 }
 0x5a3   :  { %2519 = vmatprep.subr.bf16.mxu0 %v2705_v41 }
 0x5a6   :  { %2521 = vmatpush3.bf16.msra.mxu0 %v2845_v44 }
 0x5a7   :  { %2528 = vmatprep.subr.bf16.mxu0 %v2705_v41 }
 0x5a9   :  { %2299 = vmatmul.mubr.msk.f32.vlgmr.msra.gmra.mrb[8].mxu0 %vm412_vm2, %v625_v32  ;;  %v2538_v32 = vpack.c.bf16 %v1041_v31, %v1040_v29  ;;  %v1388_v29 = vld [vmem:[%s3295_s4 + $0xa0] sm:$0xff]  ;;  %v1390_v31 = vld [vmem:[%s3295_s4 + $0xb0] sm:$0xff] }
 0x5aa   :  { %2530 = vmatpush3.bf16.msra.mxu0 %v2833_v40  ;;  %2320 = vmatprep.mubr.msk.f32.mxu0 %vm2706_vm1, %v2704_v7 }
 0x5ab   :  { %2531 = vmatprep.subr.bf16.mxu0 %v2705_v41 }
 0x5ae   :  { %2533 = vmatpush3.bf16.msra.mxu0 %v2845_v44 }
 0x5af   :  { %2540 = vmatprep.subr.bf16.mxu0 %v2705_v41 }
 0x674   :  { %v694_v34 = vpop.f32.mrb[6].mxu0 }
 0x675   :  { %v765_v35 = vadd.f32 %v764_v12, %v694_v34  ;;  %v2278_v36 = vpop.f32.mrb[7].mxu0  ;;  %v262_v12 = vadd.f32 %v2978_v59, %v93_v11 }
 0x67c   :  { %v834_v39 = vpop.f32.mrb[8].mxu0 }
 0x67d   :  { %v838_v42 = vadd.f32 %v834_v39, %v260_v38  ;;  %v2300_v43 = vpop.f32.mrb[9].mxu0  ;;  %v97_v38 = vrot.slane %v2868_v52, %v96_v37 }
 0x67f   :  { %2622 = vtanh.f32 %v838_v42  ;;  %v2128_v46 = vmul.f32 -1.442695, %v838_v42  ;;  %v331_v39 = vadd.f32 %v2871_v54, %v97_v38 }
 0x681   :  { %2624 = vpow2.f32 %v2128_v46 }
 0x689   :  { %v2623_v45 = vpop.eup %2622 }
 0x68a   :  { %848 = vrot.lane.b32.xlu1 %v2623_v45, %s2707_s11 }
 0x68b   :  { %v2625_v48 = vpop.eup %2624 }
 0x68c   :  { %v842_v50 = vadd.f32 1.0, %v2625_v48 }
 0x68e   :  { %2626 = vrcp.f32 %v842_v50 }
 0x698   :  { %v2627_v51 = vpop.eup %2626 }
 0x699   :  { %v846_v57 = vmul.f32 %v2627_v51, %v612_v22 }
 0x6fc   :  { %v849_v53 = vpop.permute.xlu1 %848 }
 0x6fd   :  { %v851_v56 = vmul.f32 %v2627_v51, %v849_v53 }
 0x6ff   :  { %853 = vrot.lane.b32.xlu0 %v851_v56, %s2708_s14 }
 0x771   :  { %v854_v26 = vpop.permute.xlu0 %853 }
 0x772   :  { %v856_v58 = vadd.f32 %v854_v26, %v846_v57 }
 0x774   :  { %2628 = vtanh.f32 %v856_v58 }
 0x77e   :  { %v2629_v4 = vpop.eup %2628 }
 0x77f   :  { %859 = vrot.lane.b32.xlu1 %v2629_v4, %s2707_s11  ;;  %v2547_v4 = vpack.c.bf16 %v1214_v2, %v1213_v1  ;;  %v1564_v1 = vld [vmem:[%s3295_s4 + $0xc8] sm:$0xff]  ;;  %v1565_v2 = vld [vmem:[%s3295_s4 + $0xd0] sm:$0xff] }
 0x7f1   :  { %v860_v5 = vpop.permute.xlu1 %859 }
 0x7f2   :  { %v862_v6 = vmul.f32 %v2627_v51, %v860_v5  ;;  %v1216_v5 = vld [vmem:[%s3295_s4 + $0x98] sm:$0xff] }
 0x7f4   :  { %868 = vrot.lane.b32.xlu0 %v862_v6, %s2708_s14  ;;  %v2550_v6 = vpack.c.bf16 %v1216_v5, %v1215_v3 }
 0x866   :  { %v869_v8 = vpop.permute.xlu0 %868 }
 0x867   :  { %2310 = vmatmul.mubr.msk.f32.vlgmr.msra.gmra.mrb[8].mxu1 %vm412_vm2, %v869_v8  ;;  %2321 = vmatmul.mubr.msk.f32.vlgmr.msra.gmra.mrb[10].mxu0 %vm412_vm2, %v869_v8 }
 0x868   :  { %2542 = vmatpush3.bf16.msra.mxu0 %v2833_v40  ;;  %2331 = vmatprep.mubr.msk.f32.mxu1 %vm2706_vm1, %v2704_v7 }
 0x869   :  { %2543 = vmatprep.subr.bf16.mxu0 %v2705_v41  ;;  %2342 = vmatprep.mubr.msk.f32.mxu0 %vm2706_vm1, %v2704_v7 }
 0x86a   :  { %2536 = vmatpush3.bf16.msra.mxu1 %v2535_v30  ;;  %v1389_v30 = vld [vmem:[%s3295_s4 + $0xa8] sm:$0xff] }
 0x86b   :  { %2537 = vmatprep.subr.bf16.mxu1 %v2705_v41 }
 0x86c   :  { %2545 = vmatpush3.bf16.msra.mxu0 %v2845_v44 }
 0x86d   :  { %2552 = vmatprep.subr.bf16.mxu0 %v2705_v41 }
 0x86e   :  { %2539 = vmatpush3.bf16.msra.mxu1 %v2538_v32  ;;  %v2559_v32 = vpack.c.bf16 %v1389_v30, %v1388_v29  ;;  %v1741_v29 = vld [vmem:[%s3295_s4 + $0xf8] sm:$0xff] }
 0x86f   :  { %2546 = vmatprep.subr.bf16.mxu1 %v2705_v41 }
 0x93a   :  { %v938_v13 = vpop.f32.mrb[8].mxu1  ;;  %v1009_v14 = vpop.f32.mrb[10].mxu0 }
 0x93b   :  { %v942_v15 = vadd.f32 %v938_v13, %v765_v35  ;;  %v1013_v16 = vadd.f32 %v1009_v14, %v262_v12  ;;  %v2311_v17 = vpop.f32.mrb[9].mxu1  ;;  %v2322_v18 = vpop.f32.mrb[11].mxu0  ;;  %v100_v13 = vsub.s32 5, %v2860_v49 }
 0x93d   :  { %2630 = vtanh.f32 %v1013_v16  ;;  %v2131_v20 = vmul.f32 -1.442695, %v1013_v16  ;;  %v101_v14 = vrot.slane %v2868_v52, %v100_v13 }
 0x93f   :  { %2632 = vpow2.f32 %v2131_v20 }
 0x947   :  { %v2631_v19 = vpop.eup %2630 }
 0x948   :  { %1023 = vrot.lane.b32.xlu1 %v2631_v19, %s2707_s11 }
 0x949   :  { %v2633_v47 = vpop.eup %2632 }
 0x94a   :  { %v1017_v21 = vadd.f32 1.0, %v2633_v47 }
 0x94c   :  { %2634 = vrcp.f32 %v1017_v21 }
 0x956   :  { %v2635_v22 = vpop.eup %2634 }
 0x957   :  { %v1021_v59 = vmul.f32 %v2635_v22, %v856_v58 }
 0x9ba   :  { %v1024_v23 = vpop.permute.xlu1 %1023 }
 0x9bb   :  { %v1026_v24 = vmul.f32 %v2635_v22, %v1024_v23 }
 0x9bd   :  { %1028 = vrot.lane.b32.xlu0 %v1026_v24, %s2708_s14 }
 0xa2f   :  { %v1029_v25 = vpop.permute.xlu0 %1028 }
 0xa30   :  { %v1031_v27 = vadd.f32 %v1029_v25, %v1021_v59 }
 0xa32   :  { %2636 = vtanh.f32 %v1031_v27 }
 0xa3c   :  { %v2637_v33 = vpop.eup %2636 }
 0xa3d   :  { %1034 = vrot.lane.b32.xlu1 %v2637_v33, %s2707_s11  ;;  %v1391_v33 = vld [vmem:[%s3295_s4 + $0xb8] sm:$0xff] }
 0xaaf   :  { %v1035_v34 = vpop.permute.xlu1 %1034 }
 0xab0   :  { %v1037_v35 = vmul.f32 %v2635_v22, %v1035_v34  ;;  %v2562_v34 = vpack.c.bf16 %v1391_v33, %v1390_v31 }
 0xab2   :  { %1043 = vrot.lane.b32.xlu0 %v1037_v35, %s2708_s14 }
 0xb24   :  { %v1044_v36 = vpop.permute.xlu0 %1043 }
 0xb25   :  { %2332 = vmatmul.mubr.msk.f32.vlgmr.msra.gmra.mrb[10].mxu1 %vm412_vm2, %v1044_v36  ;;  %2343 = vmatmul.mubr.msk.f32.vlgmr.msra.gmra.mrb[12].mxu0 %vm412_vm2, %v1044_v36 }
 0xb26   :  { %2554 = vmatpush3.bf16.msra.mxu0 %v2833_v40  ;;  %2353 = vmatprep.mubr.msk.f32.mxu1 %vm2706_vm1, %v2704_v7 }
 0xb27   :  { %2555 = vmatprep.subr.bf16.mxu0 %v2705_v41  ;;  %2364 = vmatprep.mubr.msk.f32.mxu0 %vm2706_vm1, %v2704_v7 }
 0xb28   :  { %2548 = vmatpush3.bf16.msra.mxu1 %v2547_v4  ;;  %v1566_v4 = vld [vmem:[%s3295_s4 + $0xd8] sm:$0xff] }
 0xb29   :  { %2549 = vmatprep.subr.bf16.mxu1 %v2705_v41  ;;  %v2574_v5 = vpack.c.bf16 %v1566_v4, %v1565_v2 }
 0xb2a   :  { %2557 = vmatpush3.bf16.msra.mxu0 %v2845_v44 }
 0xb2b   :  { %2564 = vmatprep.subr.bf16.mxu0 %v2705_v41 }
 0xb2c   :  { %2551 = vmatpush3.bf16.msra.mxu1 %v2550_v6 }
 0xb2d   :  { %2558 = vmatprep.subr.bf16.mxu1 %v2705_v41 }
 0xbf8   :  { %v1113_v42 = vpop.f32.mrb[10].mxu1  ;;  %v1184_v43 = vpop.f32.mrb[12].mxu0 }
 0xbf9   :  { %v1117_v45 = vadd.f32 %v1113_v42, %v942_v15  ;;  %v1188_v46 = vadd.f32 %v1184_v43, %v331_v39  ;;  %v2333_v48 = vpop.f32.mrb[11].mxu1  ;;  %v2344_v50 = vpop.f32.mrb[13].mxu0  ;;  %v333_v15 = vadd.f32 %v2873_v55, %v101_v14  ;;  %v104_v39 = vsub.s32 6, %v2860_v49 }
 0xbfb   :  { %2638 = vtanh.f32 %v1188_v46  ;;  %v2134_v53 = vmul.f32 -1.442695, %v1188_v46  ;;  %v105_v42 = vrot.slane %v2868_v52, %v104_v39 }
 0xbfd   :  { %2640 = vpow2.f32 %v2134_v53  ;;  %v402_v43 = vadd.f32 %v2986_v61, %v105_v42 }
 0xc05   :  { %v2639_v51 = vpop.eup %2638 }
 0xc06   :  { %1198 = vrot.lane.b32.xlu1 %v2639_v51, %s2707_s11 }
 0xc07   :  { %v2641_v56 = vpop.eup %2640 }
 0xc08   :  { %v1192_v57 = vadd.f32 1.0, %v2641_v56 }
 0xc0a   :  { %2642 = vrcp.f32 %v1192_v57 }
 0xc14   :  { %v2643_v26 = vpop.eup %2642 }
 0xc15   :  { %v1196_v54 = vmul.f32 %v2643_v26, %v1031_v27 }
 0xc78   :  { %v1199_v58 = vpop.permute.xlu1 %1198 }
 0xc79   :  { %v1201_v60 = vmul.f32 %v2643_v26, %v1199_v58 }
 0xc7b   :  { %1203 = vrot.lane.b32.xlu0 %v1201_v60, %s2708_s14 }
 0xced   :  { %v1204_v63 = vpop.permute.xlu0 %1203 }
 0xcee   :  { %v1206_v0 = vadd.f32 %v1204_v63, %v1196_v54 }
 0xcf0   :  { %2644 = vtanh.f32 %v1206_v0 }
 0xcfa   :  { %v2645_v8 = vpop.eup %2644 }
 0xcfb   :  { %1209 = vrot.lane.b32.xlu1 %v2645_v8, %s2707_s11 }
 0xd6d   :  { %v1210_v10 = vpop.permute.xlu1 %1209 }
 0xd6e   :  { %v1212_v11 = vmul.f32 %v2643_v26, %v1210_v10 }
 0xd70   :  { %1218 = vrot.lane.b32.xlu0 %v1212_v11, %s2708_s14 }
 0xde2   :  { %v1219_v12 = vpop.permute.xlu0 %1218 }
 0xde3   :  { %2354 = vmatmul.mubr.msk.f32.vlgmr.msra.gmra.mrb[12].mxu1 %vm412_vm2, %v1219_v12  ;;  %2365 = vmatmul.mubr.msk.f32.vlgmr.msra.gmra.mrb[14].mxu0 %vm412_vm2, %v1219_v12  ;;  %v108_v12 = vsub.s32 7, %v2860_v49 }
 0xde4   :  { %2566 = vmatpush3.bf16.msra.mxu0 %v2833_v40  ;;  %2375 = vmatprep.mubr.msk.f32.mxu1 %vm2706_vm1, %v2704_v7 }
 0xde5   :  { %2567 = vmatprep.subr.bf16.mxu0 %v2705_v41  ;;  %2386 = vmatprep.mubr.msk.f32.mxu0 %vm2706_vm1, %v2704_v7  ;;  %v109_v13 = vrot.slane %v2868_v52, %v108_v12 }
 0xde6   :  { %2560 = vmatpush3.bf16.msra.mxu1 %v2559_v32 }
 0xde7   :  { %2561 = vmatprep.subr.bf16.mxu1 %v2705_v41  ;;  %v404_v14 = vadd.f32 %v2988_v62, %v109_v13 }
 0xde8   :  { %2569 = vmatpush3.bf16.msra.mxu0 %v2845_v44 }
 0xde9   :  { %2576 = vmatprep.subr.bf16.mxu0 %v2705_v41 }
 0xdea   :  { %2563 = vmatpush3.bf16.msra.mxu1 %v2562_v34 }
 0xdeb   :  { %2570 = vmatprep.subr.bf16.mxu1 %v2705_v41 }
 0xeb6   :  { %v1288_v16 = vpop.f32.mrb[12].mxu1  ;;  %v1359_v17 = vpop.f32.mrb[14].mxu0 }
 0xeb7   :  { %v1292_v18 = vadd.f32 %v1288_v16, %v1117_v45  ;;  %v1363_v19 = vadd.f32 %v1359_v17, %v333_v15  ;;  %v2355_v20 = vpop.f32.mrb[13].mxu1  ;;  %v2366_v47 = vpop.f32.mrb[15].mxu0 }
 0xeb9   :  { %2646 = vtanh.f32 %v1363_v19  ;;  %v2137_v22 = vmul.f32 -1.442695, %v1363_v19 }
 0xebb   :  { %2648 = vpow2.f32 %v2137_v22 }
 0xec3   :  { %v2647_v21 = vpop.eup %2646 }
 0xec4   :  { %1373 = vrot.lane.b32.xlu1 %v2647_v21, %s2707_s11 }
 0xec5   :  { %v2649_v23 = vpop.eup %2648 }
 0xec6   :  { %v1367_v24 = vadd.f32 1.0, %v2649_v23 }
 0xec8   :  { %2650 = vrcp.f32 %v1367_v24 }
 0xed2   :  { %v2651_v59 = vpop.eup %2650 }
 0xed3   :  { %v1371_v55 = vmul.f32 %v2651_v59, %v1206_v0  ;;  %v1563_v0 = vld [vmem:[%s3295_s4 + $0xc0] sm:$0xff] }
 0xed4   :  { %v2571_v3 = vpack.c.bf16 %v1564_v1, %v1563_v0 }
 0xf36   :  { %v1374_v25 = vpop.permute.xlu1 %1373 }
 0xf37   :  { %v1376_v27 = vmul.f32 %v2651_v59, %v1374_v25 }
 0xf39   :  { %1378 = vrot.lane.b32.xlu0 %v1376_v27, %s2708_s14  ;;  %v1738_v27 = vld [vmem:[%s3295_s4 + $0xe0] sm:$0xff] }
 0xfab   :  { %v1379_v9 = vpop.permute.xlu0 %1378 }
 0xfac   :  { %v1381_v28 = vadd.f32 %v1379_v9, %v1371_v55  ;;  %v1739_v55 = vld [vmem:[%s3295_s4 + $0xe8] sm:$0xff]  ;;  %v1740_v9 = vld [vmem:[%s3295_s4 + $0xf0] sm:$0xff] }
 0xfad   :  { %v2586_v30 = vpack.c.bf16 %v1741_v29, %v1740_v9 }
 0xfae   :  { %2652 = vtanh.f32 %v1381_v28 }
 0xfb8   :  { %v2653_v35 = vpop.eup %2652 }
 0xfb9   :  { %1384 = vrot.lane.b32.xlu1 %v2653_v35, %s2707_s11  ;;  %v1858_v35 = vld [vmem:[%s3295_s4 + $0x100] sm:$0xff] }
0x102b   :  { %v1385_v36 = vpop.permute.xlu1 %1384 }
0x102c   :  { %v1387_v37 = vmul.f32 %v2651_v59, %v1385_v36  ;;  %v1859_v36 = vld [vmem:[%s3295_s4 + $0x108] sm:$0xff] }
0x102e   :  { %1393 = vrot.lane.b32.xlu0 %v1387_v37, %s2708_s14  ;;  %v2589_v37 = vpack.c.bf16 %v1859_v36, %v1858_v35  ;;  %v2150_v36 = vld [vmem:[%s3296_s5 + $0x4] ss:$0 sm:$0xff] }
0x10a0   :  { %v1394_v38 = vpop.permute.xlu0 %1393 }
0x10a1   :  { %2376 = vmatmul.mubr.msk.f32.vlgmr.msra.gmra.mrb[14].mxu1 %vm412_vm2, %v1394_v38  ;;  %2387 = vmatmul.mubr.msk.f32.vlgmr.msra.gmra.mrb[16].mxu0 %vm412_vm2, %v1394_v38  ;;  %v1860_v38 = vld [vmem:[%s3295_s4 + $0x110] sm:$0xff] }
0x10a2   :  { %2578 = vmatpush3.bf16.msra.mxu0 %v2833_v40  ;;  %2397 = vmatprep.mubr.msk.f32.mxu1 %vm2706_vm1, %v2704_v7 }
0x10a3   :  { %2579 = vmatprep.subr.bf16.mxu0 %v2705_v41  ;;  %2408 = vmatprep.mubr.msk.f32.mxu0 %vm2706_vm1, %v2704_v7 }
0x10a4   :  { %2572 = vmatpush3.bf16.msra.mxu1 %v2571_v3 }
0x10a5   :  { %2573 = vmatprep.subr.bf16.mxu1 %v2705_v41 }
0x10a6   :  { %2581 = vmatpush3.bf16.msra.mxu0 %v2845_v44 }
0x10a7   :  { %2588 = vmatprep.subr.bf16.mxu0 %v2705_v41 }
0x10a8   :  { %2575 = vmatpush3.bf16.msra.mxu1 %v2574_v5 }
0x10a9   :  { %2582 = vmatprep.subr.bf16.mxu1 %v2705_v41 }
0x1174   :  { %v1463_v45 = vpop.f32.mrb[14].mxu1  ;;  %v1534_v40 = vpop.f32.mrb[16].mxu0 }
0x1175   :  { %v1467_v46 = vadd.f32 %v1463_v45, %v1292_v18  ;;  %v1538_v48 = vadd.f32 %v1534_v40, %v402_v43  ;;  %v2377_v50 = vpop.f32.mrb[15].mxu1  ;;  %v2388_v51 = vpop.f32.mrb[17].mxu0  ;;  %v2145_v43 = vld [vmem:[%s3296_s5] ss:$0 sm:$0xff] }
0x1177   :  { %2654 = vtanh.f32 %v1538_v48  ;;  %v2140_v56 = vmul.f32 -1.442695, %v1538_v48 }
0x1179   :  { %2656 = vpow2.f32 %v2140_v56 }
0x1181   :  { %v2655_v53 = vpop.eup %2654 }
0x1182   :  { %1548 = vrot.lane.b32.xlu1 %v2655_v53, %s2707_s11 }
0x1183   :  { %v2657_v44 = vpop.eup %2656 }
0x1184   :  { %v1542_v57 = vadd.f32 1.0, %v2657_v44 }
0x1186   :  { %2658 = vrcp.f32 %v1542_v57 }
0x1190   :  { %v2659_v26 = vpop.eup %2658 }
0x1191   :  { %v1546_v61 = vmul.f32 %v2659_v26, %v1381_v28  ;;  %v2583_v28 = vpack.c.bf16 %v1739_v55, %v1738_v27 }
0x11f4   :  { %v1549_v58 = vpop.permute.xlu1 %1548 }
0x11f5   :  { %v1551_v60 = vmul.f32 %v2659_v26, %v1549_v58 }
0x11f7   :  { %1553 = vrot.lane.b32.xlu0 %v1551_v60, %s2708_s14 }
0x1269   :  { %v1554_v54 = vpop.permute.xlu0 %1553 }
0x126a   :  { %v1556_v63 = vadd.f32 %v1554_v54, %v1546_v61 }
0x126c   :  { %2660 = vtanh.f32 %v1556_v63 }
0x1276   :  { %v2661_v6 = vpop.eup %2660 }
0x1277   :  { %1559 = vrot.lane.b32.xlu1 %v2661_v6, %s2707_s11  ;;  %v2146_v6 = vld [vmem:[%s3296_s5 + $0x1] ss:$0 sm:$0xff] }
0x12e9   :  { %v1560_v8 = vpop.permute.xlu1 %1559 }
0x12ea   :  { %v1562_v10 = vmul.f32 %v2659_v26, %v1560_v8 }
0x12ec   :  { %1568 = vrot.lane.b32.xlu0 %v1562_v10, %s2708_s14 }
0x135e   :  { %v1569_v11 = vpop.permute.xlu0 %1568 }
0x135f   :  { %2398 = vmatmul.mubr.msk.f32.vlgmr.msra.gmra.mrb[16].mxu1 %vm412_vm2, %v1569_v11  ;;  %2409 = vmatmul.mubr.msk.f32.vlgmr.msra.gmra.mrb[18].mxu0 %vm412_vm2, %v1569_v11  ;;  %v2147_v11 = vld [vmem:[%s3296_s5 + $0x2] ss:$0 sm:$0xff] }
0x1360   :  { %2419 = vmatprep.mubr.msk.f32.mxu1 %vm2706_vm1, %v2704_v7  ;;  %2430 = vmatprep.mubr.msk.f32.mxu0 %vm2706_vm1, %v2704_v7 }
0x1361   :  { %2584 = vmatpush3.bf16.msra.mxu1 %v2583_v28  ;;  %2590 = vmatpush3.bf16.msra.mxu0 %v2589_v37 }
0x1362   :  { %2585 = vmatprep.subr.bf16.mxu1 %v2705_v41  ;;  %2591 = vmatprep.subr.bf16.mxu0 %v2705_v41 }
0x1365   :  { %2587 = vmatpush3.bf16.msra.mxu1 %v2586_v30 }
0x1366   :  { %2594 = vmatprep.subr.bf16.mxu1 %v2705_v41 }
0x1432   :  { %v1638_v15 = vpop.f32.mrb[16].mxu1  ;;  %v1709_v16 = vpop.f32.mrb[18].mxu0 }
0x1433   :  { %v1642_v17 = vadd.f32 %v1638_v15, %v1467_v46  ;;  %v1713_v18 = vadd.f32 %v1709_v16, %v404_v14  ;;  %v2399_v19 = vpop.f32.mrb[17].mxu1  ;;  %v2410_v20 = vpop.f32.mrb[19].mxu0  ;;  %v1973_v14 = vld [vmem:[%s3295_s4 + $0x120] sm:$0xff]  ;;  %v1974_v15 = vld [vmem:[%s3295_s4 + $0x128] sm:$0xff] }
0x1434   :  { %v2595_v16 = vpack.c.bf16 %v1974_v15, %v1973_v14  ;;  %v2148_v20 = vld [vmem:[%s3296_s5 + $0x3] ss:$0 sm:$0xff] }
0x1435   :  { %2662 = vtanh.f32 %v1713_v18  ;;  %v2143_v21 = vmul.f32 -1.442695, %v1713_v18  ;;  %v1976_v18 = vld [vmem:[%s3295_s4 + $0x138] sm:$0xff] }
0x1437   :  { %2664 = vpow2.f32 %v2143_v21 }
0x143f   :  { %v2663_v47 = vpop.eup %2662 }
0x1440   :  { %1723 = vrot.lane.b32.xlu1 %v2663_v47, %s2707_s11 }
0x1441   :  { %v2665_v22 = vpop.eup %2664 }
0x1442   :  { %v1717_v23 = vadd.f32 1.0, %v2665_v22 }
0x1444   :  { %2666 = vrcp.f32 %v1717_v23 }
0x144e   :  { %v2667_v49 = vpop.eup %2666 }
0x144f   :  { %v1721_v62 = vmul.f32 %v2667_v49, %v1556_v63 }
0x14b2   :  { %v1724_v24 = vpop.permute.xlu1 %1723 }
0x14b3   :  { %v1726_v52 = vmul.f32 %v2667_v49, %v1724_v24 }
0x14b5   :  { %1728 = vrot.lane.b32.xlu0 %v1726_v52, %s2708_s14 }
0x1527   :  { %v1729_v59 = vpop.permute.xlu0 %1728 }
0x1528   :  { %v1731_v25 = vadd.f32 %v1729_v59, %v1721_v62 }
0x152a   :  { %2668 = vtanh.f32 %v1731_v25 }
0x1534   :  { %v2669_v31 = vpop.eup %2668 }
0x1535   :  { %1734 = vrot.lane.b32.xlu1 %v2669_v31, %s2707_s11 }
0x15a7   :  { %v1735_v32 = vpop.permute.xlu1 %1734 }
0x15a8   :  { %v1737_v33 = vmul.f32 %v2667_v49, %v1735_v32 }
0x15aa   :  { %1743 = vrot.lane.b32.xlu0 %v1737_v33, %s2708_s14  ;;  %s2709_s14 = smov [#allocation2]  }
0x15ab   :  { %s2107_s26 = sshll.u32 %s2709_s14, 4  ;;  %s2108_s26 = int_to_ptr.vmem [resolvable:$true] %s2107_s26 }
0x15ac   :  { %p2685_p1 = scmp.lt.s32.totalorder %s2108_s26, %s2108_s26 }
0x161c   :  { %v1744_v34 = vpop.permute.xlu0 %1743 }
0x161d   :  { %2420 = vmatmul.mubr.msk.f32.vlgmr.msra.gmra.mrb[18].mxu1 %vm412_vm2, %v1744_v34 }
0x161e   :  { %2441 = vmatprep.mubr.msk.f32.mxu1 %vm2706_vm1, %v2704_v7  ;;  %v1861_v7 = vld [vmem:[%s3295_s4 + $0x118] sm:$0xff]  ;;  %2596 = vmatpush3.bf16.msra.mxu1 %v2595_v16 }
0x161f   :  { %v2592_v39 = vpack.c.bf16 %v1861_v7, %v1860_v38  ;;  %2597 = vmatprep.subr.bf16.mxu1 %v2705_v41  ;;  %v2151_v7 = vld [vmem:[%s3296_s5 + $0x5] ss:$0 sm:$0xff] }
0x1621   :  { %2593 = vmatpush3.bf16.msra.mxu0 %v2592_v39 }
0x16f0   :  { %v1813_v42 = vpop.f32.mrb[18].mxu1 }
0x16f1   :  { %v1817_v45 = vadd.f32 %v1813_v42, %v1642_v17  ;;  %v2421_v40 = vpop.f32.mrb[19].mxu1  ;;  %v1975_v17 = vld [vmem:[%s3295_s4 + $0x130] sm:$0xff] }
0x16f2   :  { %v2598_v19 = vpack.c.bf16 %v1976_v18, %v1975_v17 }
0x16f3   :  { %v1823_v46 = vadd.f32 %v2145_v43, %v1817_v45  ;;  %v2152_v43 = vld [vmem:[%s3296_s5 + $0x6] ss:$0 sm:$0xff] }
0x16f4   :  { %2599 = vmatpush3.bf16.msra.mxu1 %v2598_v19 }
0x16f5   :  { %v1826_v48 = vsel %vm412_vm2, %v1823_v46, 0.0 }
0x16f6   :  { %v1827_v50 = vrot.slane %v1826_v48, 4 }
0x16f8   :  { %v1828_v51 = vadd.f32 %v1827_v50, %v1826_v48 }
0x16fa   :  { %v1829_v53 = vrot.slane %v1828_v51, 2 }
0x16fc   :  { %v1830_v56 = vadd.f32 %v1829_v53, %v1828_v51 }
0x16fe   :  { %v1831_v44 = vrot.slane %v1830_v56, 1 }
0x1700   :  { %v1832_v57 = vadd.f32 %v1831_v44, %v1830_v56 }
0x1702   :  { %v1834_v26 = vmul.f32 0.125, %v1832_v57 }
0x1704   :  { %v1835_v58 = vsub.f32 %v1823_v46, %v1834_v26 }
0x1706   :  { %v1836_v60 = vmul.f32 %v1835_v58, %v1835_v58  ;;  %v1849_v8 = vmul.f32 %v2146_v6, %v1835_v58  ;;  %v2154_v6 = vld [vmem:[%s3296_s5 + $0x7] ss:$0 sm:$0xff] }
0x1708   :  { %v1837_v61 = vsel %vm412_vm2, %v1836_v60, 0.0 }
0x1709   :  { %v1838_v54 = vrot.slane %v1837_v61, 4 }
0x170b   :  { %v1839_v63 = vadd.f32 %v1838_v54, %v1837_v61 }
0x170d   :  { %v1840_v0 = vrot.slane %v1839_v63, 2 }
0x170f   :  { %v1841_v1 = vadd.f32 %v1840_v0, %v1839_v63 }
0x1711   :  { %v1842_v2 = vrot.slane %v1841_v1, 1 }
0x1713   :  { %v1843_v3 = vadd.f32 %v1842_v2, %v1841_v1 }
0x1715   :  { %v1844_v4 = vmul.f32 0.125, %v1843_v3 }
0x1717   :  { %v1850_v5 = vadd.f32 1e-05, %v1844_v4 }
0x1719   :  { %2670 = vrsqrt.f32 %v1850_v5 }
0x1723   :  { %v2671_v10 = vpop.eup %2670 }
0x1724   :  { %v1852_v12 = vmul.f32 %v2671_v10, %v1849_v8 }
0x1726   :  { %v1857_v13 = vadd.f32 %v2147_v11, %v1852_v12  ;;  %v2155_v11 = vld [vmem:[%s3296_s5 + $0x8] ss:$0 sm:$0xff]  ;;  %s2680_s5 = scalar_lea.vmem %s2108_s26, 128 }
0x1727   :  { %p2681_p0 = scmp.ne.s32.totalorder %s2108_s26, %s2680_s5  ;;  %p2686_p2 = scmp.lt.s32.totalorder %s2680_s5, %s2680_s5 }
0x1728   :  { %2431 = vmatmul.mubr.msk.f32.vlgmr.msra.gmra.mrb[20].mxu0 %vm412_vm2, %v1857_v13 }
0x1729   :  { %p2687_p3 = por %p2686_p2, %p2685_p1 }
0x172b   :  { %p2688_p4 = pnand %p2687_p3, %p2681_p0 }
0x17fb   :  { %v1936_v47 = vpop.f32.mrb[20].mxu0 }
0x17fc   :  { %v1937_v21 = vadd.f32 %v2148_v20, %v1936_v47  ;;  %v2432_v22 = vpop.f32.mrb[21].mxu0 }
0x17fe   :  { %v1942_v23 = vsel %vm412_vm2, %v1937_v21, 0.0 }
0x17ff   :  { %v1943_v41 = vrot.slane %v1942_v23, 4 }
0x1801   :  { %v1944_v49 = vadd.f32 %v1943_v41, %v1942_v23 }
0x1803   :  { %v1945_v24 = vrot.slane %v1944_v49, 2 }
0x1805   :  { %v1946_v52 = vadd.f32 %v1945_v24, %v1944_v49 }
0x1807   :  { %v1947_v62 = vrot.slane %v1946_v52, 1 }
0x1809   :  { %v1948_v59 = vadd.f32 %v1947_v62, %v1946_v52 }
0x180b   :  { %v1949_v25 = vmul.f32 0.125, %v1948_v59 }
0x180d   :  { %v1950_v27 = vsub.f32 %v1937_v21, %v1949_v25 }
0x180f   :  { %v1951_v55 = vmul.f32 %v1950_v27, %v1950_v27  ;;  %v1964_v37 = vmul.f32 %v2150_v36, %v1950_v27 }
0x1811   :  { %v1952_v9 = vsel %vm412_vm2, %v1951_v55, 0.0 }
0x1812   :  { %v1953_v28 = vrot.slane %v1952_v9, 4 }
0x1814   :  { %v1954_v29 = vadd.f32 %v1953_v28, %v1952_v9 }
0x1816   :  { %v1955_v30 = vrot.slane %v1954_v29, 2 }
0x1818   :  { %v1956_v31 = vadd.f32 %v1955_v30, %v1954_v29 }
0x181a   :  { %v1957_v32 = vrot.slane %v1956_v31, 1 }
0x181c   :  { %v1958_v33 = vadd.f32 %v1957_v32, %v1956_v31 }
0x181e   :  { %v1959_v34 = vmul.f32 0.125, %v1958_v33 }
0x1820   :  { %v1965_v35 = vadd.f32 1e-05, %v1959_v34 }
0x1822   :  { %2672 = vrsqrt.f32 %v1965_v35 }
0x182c   :  { %v2673_v38 = vpop.eup %2672 }
0x182d   :  { %v1967_v39 = vmul.f32 %v2673_v38, %v1964_v37 }
0x182f   :  { %v1972_v42 = vadd.f32 %v2151_v7, %v1967_v39 }
0x1831   :  { %2442 = vmatmul.mubr.msk.f32.vlgmr.msra.gmra.mrb[20].mxu1 %vm412_vm2, %v1972_v42 }
0x1904   :  { %v2051_v45 = vpop.f32.mrb[20].mxu1 }
0x1905   :  { %v2052_v40 = vadd.f32 %v2152_v43, %v2051_v45  ;;  %v2443_v46 = vpop.f32.mrb[21].mxu1 }
0x1907   :  { %v2057_v48 = vsel %vm412_vm2, %v2052_v40, 0.0 }
0x1908   :  { %v2058_v50 = vrot.slane %v2057_v48, 4 }
0x190a   :  { %v2059_v51 = vadd.f32 %v2058_v50, %v2057_v48 }
0x190c   :  { %v2060_v53 = vrot.slane %v2059_v51, 2 }
0x190e   :  { %v2061_v56 = vadd.f32 %v2060_v53, %v2059_v51 }
0x1910   :  { %v2062_v44 = vrot.slane %v2061_v56, 1 }
0x1912   :  { %v2063_v57 = vadd.f32 %v2062_v44, %v2061_v56 }
0x1914   :  { %v2064_v26 = vmul.f32 0.125, %v2063_v57 }
0x1916   :  { %v2065_v58 = vsub.f32 %v2052_v40, %v2064_v26 }
0x1918   :  { %v2066_v60 = vmul.f32 %v2065_v58, %v2065_v58  ;;  %v2079_v8 = vmul.f32 %v2154_v6, %v2065_v58 }
0x191a   :  { %v2067_v61 = vsel %vm412_vm2, %v2066_v60, 0.0 }
0x191b   :  { %v2068_v54 = vrot.slane %v2067_v61, 4 }
0x191d   :  { %v2069_v63 = vadd.f32 %v2068_v54, %v2067_v61 }
0x191f   :  { %v2070_v0 = vrot.slane %v2069_v63, 2 }
0x1921   :  { %v2071_v1 = vadd.f32 %v2070_v0, %v2069_v63 }
0x1923   :  { %v2072_v2 = vrot.slane %v2071_v1, 1 }
0x1925   :  { %v2073_v3 = vadd.f32 %v2072_v2, %v2071_v1 }
0x1927   :  { %v2074_v4 = vmul.f32 0.125, %v2073_v3 }
0x1929   :  { %v2080_v5 = vadd.f32 1e-05, %v2074_v4 }
0x192b   :  { %2674 = vrsqrt.f32 %v2080_v5 }
0x1935   :  { %v2675_v10 = vpop.eup %2674 }
0x1936   :  { %v2082_v12 = vmul.f32 %v2675_v10, %v2079_v8 }
0x1938   :  { %v2087_v13 = vadd.f32 %v2155_v11, %v2082_v12 }
0x193a   :  { %v2089_v14 = vsel %vm2088_vm3, %v2087_v13, -inf }
0x193b   :  { %2090 = vmax.xlane.f32.xlu1 %v2089_v14 }
0x19c8   :  { %v2091_v15 = vpop.xlane.xlu1 %2090 }
0x19c9   :  { %v2092_v16 = vsub.f32 %v2087_v13, %v2091_v15 }
0x19cb   :  { %v2093_v17 = vmul.f32 1.442695, %v2092_v16 }
0x19cd   :  { %2676 = vpow2.f32 %v2093_v17 }
0x19d7   :  { %v2677_v18 = vpop.eup %2676 }
0x19d8   :  { %v2095_v19 = vsel %vm2088_vm3, %v2677_v18, 0.0 }
0x19d9   :  { %2096 = vadd.xlane.f32.xlu0 %v2095_v19 }
0x1a66   :  { %v2097_v20 = vpop.xlane.xlu0 %2096 }
0x1a67   :  { %2678 = vrcp.f32 %v2097_v20 }
0x1a71   :  { %v2679_v47 = vpop.eup %2678 }
0x1a72   :  { %v2099_v21 = vmul.f32 %v2679_v47, %v2677_v18 }
0x1a74   :  { %2100 = vst.msk [vmem:[#allocation2] sm:$0xff] %vm2088_vm3, %v2099_v21 }
0x1a75   :  { %2691 = shalt.err (!%p2688_p4)
}
0x1a76   :  { %s2692_s29 = scalar_lea.hbm %s3297_s6, 128 }
0x1a77   :  { %p2693_p5 = scmp.ne.s32.totalorder %s3297_s6, %s2692_s29  ;;  %p2696_p6 = scmp.lt.u32.totalorder %s2692_s29, %s3297_s6 }
0x1a79   :  { %p2698_p7 = pnand %p2696_p6, %p2693_p5 }
0x1a7b   :  { %2701 = shalt.err (!%p2698_p7)
}
0x1a7c   :  { %2110 = dma.vmem_to_hbm [thread:$0]  %s2108_s26, 128, %s3297_s6, [#allocation3]  }
0x1a7d   :  { %2702 = dma.done.wait [#allocation3], 128  }
0x1a7e   :  { %2703 = vsyncadd [#allocation3], 4294967168 }
0x1a7f   :  { %2114 = vsyncpa [#allocation3], 1 }

</bundles_post_ra>
